<compile_context>
chip_gen: v7x
topology: tpu7x:2x2x1
jax: 0.10.0
libtpu: 0.0.40
codegen_flags: <defaults>
</compile_context>

<pallas_src>
import functools

import jax
import jax.numpy as jnp
from jax.experimental import pallas as pl
from jax.experimental.pallas import tpu as pltpu

BN_EPS = 1e-5
_VMEM_LIMIT = 48 * 1024 * 1024  # > v5e's 16 MiB default, < v7x's 64 MiB physical


# --------------------------------------------------------------------------- #
# Pass 1: ReLU -> 3x3 conv (pad=1) on one (TH x W) row slab + BN1 partials.
# --------------------------------------------------------------------------- #
def _conv3x3_stats_kernel(x_ref, top_ref, bot_ref, w1_ref, y_ref, s_ref, ss_ref):
    # x_ref   : (1, TH, W+2, C)  W-padded rows of this slab
    # top_ref : (1, 1,  W+2, C)  row above the slab (clamped; zeroed at image top)
    # bot_ref : (1, 1,  W+2, C)  row below the slab (clamped; zeroed at image bottom)
    # w1_ref  : (3, 3, Cin, Cout) conv weights (resident across grid steps)
    # y_ref   : (1, TH, W, C)    conv output (pre-BN)
    # s_ref   : (1, 1, 1, C)     per-tile channel sum of y
    # ss_ref  : (1, 1, 1, C)     per-tile channel sum of y^2
    _, TH, Wp, C = x_ref.shape
    W = Wp - 2
    hb = pl.program_id(1)
    last_hb = pl.num_programs(1) - 1

    # relu(pad(x)) == pad(relu(x)) because relu(0) == 0.
    main = jnp.maximum(x_ref[0], 0.0)                                   # (TH, Wp, C)
    top = jnp.where(hb > 0, jnp.maximum(top_ref[0, 0], 0.0), 0.0)[None]  # (1, Wp, C)
    bot = jnp.where(hb < last_hb, jnp.maximum(bot_ref[0, 0], 0.0), 0.0)[None]

    # (TH+2, W+2, C) halo slab; halo rows come from neighbour tiles (or zero).
    hp = jnp.concatenate([top, main, bot], axis=0)

    R = TH * W
    acc = jnp.zeros((R, C), jnp.float32)
    for dx in range(3):
        # Hoist the W (sublane) slice out of the dy loop: 3 slices per tile
        # instead of 9 full-size slice+reshape copies.
        hp_dx = hp[:, dx:dx + W, :]                                     # (TH+2, W, C)
        for dy in range(3):
            # rows [dy, dy+TH) of the slab are in[h + dy - 1] for output row h.
            patch = hp_dx[dy:dy + TH].reshape(R, C)
            acc = acc + jnp.dot(patch, w1_ref[dy, dx],
                                preferred_element_type=jnp.float32)

    y_ref[0] = acc.reshape(TH, W, C)
    # Fused BN1 partials (no centred-square second pass over the tensor).
    s_ref[0, 0] = jnp.sum(acc, axis=0, keepdims=True)
    ss_ref[0, 0] = jnp.sum(acc * acc, axis=0, keepdims=True)


# --------------------------------------------------------------------------- #
# Pass 2: BN1 (scale/shift) -> ReLU -> 1x1 conv on a row tile + BN2 partials.
# --------------------------------------------------------------------------- #
def _bn_relu_conv1x1_stats_kernel(y_ref, sc_ref, sh_ref, w2_ref,
                                  z_ref, s_ref, ss_ref):
    h = jnp.maximum(y_ref[...] * sc_ref[...] + sh_ref[...], 0.0)        # (TR, C)
    z = jnp.dot(h, w2_ref[...], preferred_element_type=jnp.float32)     # (TR, C)
    z_ref[...] = z
    s_ref[0] = jnp.sum(z, axis=0, keepdims=True)
    ss_ref[0] = jnp.sum(z * z, axis=0, keepdims=True)


# --------------------------------------------------------------------------- #
# Pass 3: BN2 (scale/shift) + residual add on a row tile.
# --------------------------------------------------------------------------- #
def _bn_residual_kernel(z_ref, x_ref, sc_ref, sh_ref, o_ref):
    o_ref[...] = x_ref[...] + z_ref[...] * sc_ref[...] + sh_ref[...]


# --------------------------------------------------------------------------- #
# Wrapper
# --------------------------------------------------------------------------- #
def _largest_divisor(n, limit, multiple_of=1):
    """Largest d <= limit with n % d == 0 and d % multiple_of == 0 (fallback n)."""
    best = 0
    for d in range(1, min(n, limit) + 1):
        if n % d == 0 and d % multiple_of == 0:
            best = d
    return best if best > 0 else n


def resblock_forward(x_nchw, params, *, block_h=16, block_rows=1024):
    """ResBlock forward. x_nchw: (N, C, H, W) float32. Returns (N, C, H, W)."""
    x = jnp.transpose(x_nchw, (0, 2, 3, 1)).astype(jnp.float32)         # NHWC
    N, H, W, C = x.shape

    # Zero-pad only along W (2 extra columns, ~2/W of x) so the dx taps are
    # plain in-kernel slices; the H halo is handled with 1-row BlockSpec inputs.
    xw = jnp.pad(x, ((0, 0), (0, 0), (1, 1), (0, 0)))                    # (N,H,W+2,C)

    # PyTorch OIHW -> (kh, kw, cin, cout) and (cin, cout).  Conv biases are
    # intentionally unused (exactly cancelled by the training-mode BatchNorms).
    w1 = jnp.transpose(params["w1"], (2, 3, 1, 0)).astype(jnp.float32)
    w2 = jnp.transpose(params["w2"][:, :, 0, 0], (1, 0)).astype(jnp.float32)

    TH = _largest_divisor(H, block_h)
    HB = H // TH
    count = float(N * H * W)

    # ---------------- pass 1: conv3x3 + BN1 partial stats -------------------
    y, s1, ss1 = pl.pallas_call(
        _conv3x3_stats_kernel,
        grid=(N, HB),
        in_specs=[
            pl.BlockSpec((1, TH, W + 2, C), lambda n, hb: (n, hb, 0, 0)),
            pl.BlockSpec((1, 1, W + 2, C),
                         lambda n, hb: (n, jnp.maximum(hb * TH - 1, 0), 0, 0)),
            pl.BlockSpec((1, 1, W + 2, C),
                         lambda n, hb: (n, jnp.minimum((hb + 1) * TH, H - 1), 0, 0)),
            pl.BlockSpec((3, 3, C, C), lambda n, hb: (0, 0, 0, 0)),  # resident
        ],
        out_shape=(
            jax.ShapeDtypeStruct((N, H, W, C), jnp.float32),
            jax.ShapeDtypeStruct((N, HB, 1, C), jnp.float32),
            jax.ShapeDtypeStruct((N, HB, 1, C), jnp.float32),
        ),
        out_specs=(
            pl.BlockSpec((1, TH, W, C), lambda n, hb: (n, hb, 0, 0)),
            pl.BlockSpec((1, 1, 1, C), lambda n, hb: (n, hb, 0, 0)),
            pl.BlockSpec((1, 1, 1, C), lambda n, hb: (n, hb, 0, 0)),
        ),
        compiler_params=pltpu.CompilerParams(
            dimension_semantics=("parallel", "parallel"),
            vmem_limit_bytes=_VMEM_LIMIT),
    )(xw, xw, xw, w1)

    # BN1: combine the tiny per-tile partials, fold into scale/shift.
    sum1 = jnp.sum(s1, axis=(0, 1, 2))
    sumsq1 = jnp.sum(ss1, axis=(0, 1, 2))
    mean1 = sum1 / count
    var1 = jnp.maximum(sumsq1 / count - mean1 * mean1, 0.0)
    scale1 = params["g1"].astype(jnp.float32) * jax.lax.rsqrt(var1 + BN_EPS)
    shift1 = params["be1"].astype(jnp.float32) - mean1 * scale1

    R = N * H * W
    TR = _largest_divisor(R, block_rows, multiple_of=8)
    RB = R // TR
    y_flat = y.reshape(R, C)        # free: contiguous NHWC flatten
    x_flat = x.reshape(R, C)

    row_spec = pl.BlockSpec((TR, C), lambda r: (r, 0))
    vec_spec = pl.BlockSpec((1, C), lambda r: (0, 0))        # resident vectors

    # ---------------- pass 2: BN1 -> ReLU -> conv1x1 + BN2 partial stats ----
    z, s2, ss2 = pl.pallas_call(
        _bn_relu_conv1x1_stats_kernel,
        grid=(RB,),
        in_specs=[row_spec, vec_spec, vec_spec,
                  pl.BlockSpec((C, C), lambda r: (0, 0))],
        out_shape=(
            jax.ShapeDtypeStruct((R, C), jnp.float32),
            jax.ShapeDtypeStruct((RB, 1, C), jnp.float32),
            jax.ShapeDtypeStruct((RB, 1, C), jnp.float32),
        ),
        out_specs=(
            row_spec,
            pl.BlockSpec((1, 1, C), lambda r: (r, 0, 0)),
            pl.BlockSpec((1, 1, C), lambda r: (r, 0, 0)),
        ),
        compiler_params=pltpu.CompilerParams(
            dimension_semantics=("parallel",),
            vmem_limit_bytes=_VMEM_LIMIT),
    )(y_flat, scale1.reshape(1, C), shift1.reshape(1, C), w2)

    # BN2 scale/shift.
    sum2 = jnp.sum(s2, axis=(0, 1))
    sumsq2 = jnp.sum(ss2, axis=(0, 1))
    mean2 = sum2 / count
    var2 = jnp.maximum(sumsq2 / count - mean2 * mean2, 0.0)
    scale2 = params["g2"].astype(jnp.float32) * jax.lax.rsqrt(var2 + BN_EPS)
    shift2 = params["be2"].astype(jnp.float32) - mean2 * scale2

    # ---------------- pass 3: BN2 + residual add -----------------------------
    out_flat = pl.pallas_call(
        _bn_residual_kernel,
        grid=(RB,),
        in_specs=[row_spec, row_spec, vec_spec, vec_spec],
        out_shape=jax.ShapeDtypeStruct((R, C), jnp.float32),
        out_specs=row_spec,
        compiler_params=pltpu.CompilerParams(
            dimension_semantics=("parallel",),
            vmem_limit_bytes=_VMEM_LIMIT),
    )(z, x_flat, scale2.reshape(1, C), shift2.reshape(1, C))

    return jnp.transpose(out_flat.reshape(N, H, W, C), (0, 3, 1, 2))     # NCHW


# --------------------------------------------------------------------------- #
# Params / reference / test
# --------------------------------------------------------------------------- #
def init_params(key, C):
    """Deterministic init matching PyTorch defaults (kaiming-uniform bounds)."""
    k0, k1, k2, k3 = jax.random.split(key, 4)
    bound1 = 1.0 / float(jnp.sqrt(C * 9))
    bound2 = 1.0 / float(jnp.sqrt(C))
    return dict(
        w1=jax.random.uniform(k0, (C, C, 3, 3), jnp.float32, -bound1, bound1),
        b1=jax.random.uniform(k1, (C,), jnp.float32, -bound1, bound1),
        w2=jax.random.uniform(k2, (C, C, 1, 1), jnp.float32, -bound2, bound2),
        b2=jax.random.uniform(k3, (C,), jnp.float32, -bound2, bound2),
        g1=jnp.ones((C,), jnp.float32), be1=jnp.zeros((C,), jnp.float32),
        g2=jnp.ones((C,), jnp.float32), be2=jnp.zeros((C,), jnp.float32),
    )


def reference_forward(x, params):
    """Pure-JAX reference with identical semantics (NCHW, includes conv biases)."""
    def bn(t, g, b):
        mean = jnp.mean(t, axis=(0, 2, 3), keepdims=True)
        var = jnp.mean((t - mean) ** 2, axis=(0, 2, 3), keepdims=True)
        return ((t - mean) * jax.lax.rsqrt(var + BN_EPS)
                * g[None, :, None, None] + b[None, :, None, None])

    h = jax.nn.relu(x)
    y = jax.lax.conv_general_dilated(
        h, params["w1"], (1, 1), ((1, 1), (1, 1)),
        dimension_numbers=("NCHW", "OIHW", "NCHW"),
        precision=jax.lax.Precision.HIGHEST) + params["b1"][None, :, None, None]
    y = jax.nn.relu(bn(y, params["g1"], params["be1"]))
    z = jax.lax.conv_general_dilated(
        y, params["w2"], (1, 1), ((0, 0), (0, 0)),
        dimension_numbers=("NCHW", "OIHW", "NCHW"),
        precision=jax.lax.Precision.HIGHEST) + params["b2"][None, :, None, None]
    z = bn(z, params["g2"], params["be2"])
    return x + z


if __name__ == "__main__":
    key = jax.random.PRNGKey(0)
    kx, kp = jax.random.split(key)

    N, C, H, W = 2, 4, 16, 16
    x = jax.random.normal(kx, (N, C, H, W), jnp.float32)
    params = init_params(kp, C)

    # Small tiles so the test exercises multi-tile grids, halo rows and the
    # cross-tile BN stat combination (block_h / block_rows are tunable knobs).
    fwd = jax.jit(functools.partial(resblock_forward, block_h=8, block_rows=128))
    out = jax.block_until_ready(fwd(x, params))

    ref = reference_forward(x, params)
    assert out.shape == (N, C, H, W)
    max_err = float(jnp.max(jnp.abs(out - ref)))
    assert max_err < 1e-3, f"max abs error vs reference: {max_err}"

    print("KERNEL_OK")
</pallas_src>

<mosaic_0001>
module attributes {stable_mosaic.version = 11 : i64} {
  func.func @_conv3x3_stats_kernel(%arg0: i32, %arg1: i32, %arg2: memref<1x8x18x4xf32, #tpu.memory_space<vmem>>, %arg3: memref<1x1x18x4xf32, #tpu.memory_space<vmem>>, %arg4: memref<1x1x18x4xf32, #tpu.memory_space<vmem>>, %arg5: memref<3x3x4x4xf32, #tpu.memory_space<vmem>>, %arg6: memref<1x8x16x4xf32, #tpu.memory_space<vmem>>, %arg7: memref<1x1x1x4xf32, #tpu.memory_space<vmem>>, %arg8: memref<1x1x1x4xf32, #tpu.memory_space<vmem>>) attributes {dimension_semantics = [#tpu.dimension_semantics<parallel>, #tpu.dimension_semantics<parallel>], iteration_bounds = array<i64: 2, 2>, scalar_prefetch = 0 : i64, scratch_operands = 0 : i64, tpu.core_type = #tpu.core_type<tc>, window_params = [{transform_indices = @transform_0, window_bounds = array<i64: 1, 8, 18, 4>}, {transform_indices = @transform_1, window_bounds = array<i64: 1, 1, 18, 4>}, {transform_indices = @transform_2, window_bounds = array<i64: 1, 1, 18, 4>}, {pipeline_mode = #tpu.pipeline_mode<synchronous>, transform_indices = @transform_3, window_bounds = array<i64: 3, 3, 4, 4>}, {transform_indices = @transform_4, window_bounds = array<i64: 1, 8, 16, 4>}, {transform_indices = @transform_5, window_bounds = array<i64: 1, 1, 1, 4>}, {transform_indices = @transform_6, window_bounds = array<i64: 1, 1, 1, 4>}]} {
    %c0 = arith.constant 0 : index
    %c0_0 = arith.constant 0 : index
    %c0_1 = arith.constant 0 : index
    %c0_2 = arith.constant 0 : index
    %0 = vector.load %arg2[%c0, %c0_0, %c0_1, %c0_2] : memref<1x8x18x4xf32, #tpu.memory_space<vmem>>, vector<1x8x18x4xf32>
    %1 = vector.shape_cast %0 : vector<1x8x18x4xf32> to vector<8x18x4xf32>
    %cst = arith.constant 0.000000e+00 : f32
    %2 = vector.broadcast %cst : f32 to vector<8x18x4xf32>
    %3 = arith.maximumf %1, %2 : vector<8x18x4xf32>
    %c0_i32 = arith.constant 0 : i32
    %4 = arith.cmpi sgt, %arg1, %c0_i32 : i32
    %c0_3 = arith.constant 0 : index
    %c0_4 = arith.constant 0 : index
    %c0_5 = arith.constant 0 : index
    %c0_6 = arith.constant 0 : index
    %5 = vector.load %arg3[%c0_3, %c0_4, %c0_5, %c0_6] : memref<1x1x18x4xf32, #tpu.memory_space<vmem>>, vector<1x1x18x4xf32>
    %6 = vector.shape_cast %5 : vector<1x1x18x4xf32> to vector<18x4xf32>
    %cst_7 = arith.constant 0.000000e+00 : f32
    %7 = vector.broadcast %cst_7 : f32 to vector<18x4xf32>
    %8 = arith.maximumf %6, %7 : vector<18x4xf32>
    %cst_8 = arith.constant 0.000000e+00 : f32
    %9 = vector.broadcast %cst_8 : f32 to vector<18x4xf32>
    %10 = arith.select %4, %8, %9 : vector<18x4xf32>
    %11 = vector.shape_cast %10 : vector<18x4xf32> to vector<1x18x4xf32>
    %c1_i32 = arith.constant 1 : i32
    %12 = arith.cmpi slt, %arg1, %c1_i32 : i32
    %c0_9 = arith.constant 0 : index
    %c0_10 = arith.constant 0 : index
    %c0_11 = arith.constant 0 : index
    %c0_12 = arith.constant 0 : index
    %13 = vector.load %arg4[%c0_9, %c0_10, %c0_11, %c0_12] : memref<1x1x18x4xf32, #tpu.memory_space<vmem>>, vector<1x1x18x4xf32>
    %14 = vector.shape_cast %13 : vector<1x1x18x4xf32> to vector<18x4xf32>
    %cst_13 = arith.constant 0.000000e+00 : f32
    %15 = vector.broadcast %cst_13 : f32 to vector<18x4xf32>
    %16 = arith.maximumf %14, %15 : vector<18x4xf32>
    %cst_14 = arith.constant 0.000000e+00 : f32
    %17 = vector.broadcast %cst_14 : f32 to vector<18x4xf32>
    %18 = arith.select %12, %16, %17 : vector<18x4xf32>
    %19 = vector.shape_cast %18 : vector<18x4xf32> to vector<1x18x4xf32>
    %20 = tpu.concatenate %11, %3, %19 in 0 : vector<1x18x4xf32>, vector<8x18x4xf32>, vector<1x18x4xf32> -> vector<10x18x4xf32>
    %cst_15 = arith.constant 0.000000e+00 : f32
    %21 = vector.broadcast %cst_15 : f32 to vector<128x4xf32>
    %22 = vector.extract_strided_slice %20 {offsets = [0, 0, 0], sizes = [10, 16, 4], strides = [1, 1, 1]} : vector<10x18x4xf32> to vector<10x16x4xf32>
    %23 = vector.extract_strided_slice %22 {offsets = [0, 0, 0], sizes = [8, 16, 4], strides = [1, 1, 1]} : vector<10x16x4xf32> to vector<8x16x4xf32>
    %24 = vector.shape_cast %23 : vector<8x16x4xf32> to vector<128x4xf32>
    %c0_16 = arith.constant 0 : index
    %c0_17 = arith.constant 0 : index
    %c0_18 = arith.constant 0 : index
    %c0_19 = arith.constant 0 : index
    %25 = vector.load %arg5[%c0_16, %c0_17, %c0_18, %c0_19] : memref<3x3x4x4xf32, #tpu.memory_space<vmem>>, vector<1x1x4x4xf32>
    %26 = vector.shape_cast %25 : vector<1x1x4x4xf32> to vector<4x4xf32>
    %cst_20 = arith.constant dense<0.000000e+00> : vector<128x4xf32>
    %27 = tpu.matmul %24, %26, %cst_20 {dimension_numbers = #tpu.dot_dimension_numbers<[1], [0], [0], [1], [0, 0, 1, 1], [], []>} : vector<128x4xf32>, vector<4x4xf32>, vector<128x4xf32> -> vector<128x4xf32>
    %28 = arith.addf %21, %27 : vector<128x4xf32>
    %29 = vector.extract_strided_slice %22 {offsets = [1, 0, 0], sizes = [8, 16, 4], strides = [1, 1, 1]} : vector<10x16x4xf32> to vector<8x16x4xf32>
    %30 = vector.shape_cast %29 : vector<8x16x4xf32> to vector<128x4xf32>
    %c1 = arith.constant 1 : index
    %c0_21 = arith.constant 0 : index
    %c0_22 = arith.constant 0 : index
    %c0_23 = arith.constant 0 : index
    %31 = vector.load %arg5[%c1, %c0_21, %c0_22, %c0_23] : memref<3x3x4x4xf32, #tpu.memory_space<vmem>>, vector<1x1x4x4xf32>
    %32 = vector.shape_cast %31 : vector<1x1x4x4xf32> to vector<4x4xf32>
    %cst_24 = arith.constant dense<0.000000e+00> : vector<128x4xf32>
    %33 = tpu.matmul %30, %32, %cst_24 {dimension_numbers = #tpu.dot_dimension_numbers<[1], [0], [0], [1], [0, 0, 1, 1], [], []>} : vector<128x4xf32>, vector<4x4xf32>, vector<128x4xf32> -> vector<128x4xf32>
    %34 = arith.addf %28, %33 : vector<128x4xf32>
    %35 = vector.extract_strided_slice %22 {offsets = [2, 0, 0], sizes = [8, 16, 4], strides = [1, 1, 1]} : vector<10x16x4xf32> to vector<8x16x4xf32>
    %36 = vector.shape_cast %35 : vector<8x16x4xf32> to vector<128x4xf32>
    %c2 = arith.constant 2 : index
    %c0_25 = arith.constant 0 : index
    %c0_26 = arith.constant 0 : index
    %c0_27 = arith.constant 0 : index
    %37 = vector.load %arg5[%c2, %c0_25, %c0_26, %c0_27] : memref<3x3x4x4xf32, #tpu.memory_space<vmem>>, vector<1x1x4x4xf32>
    %38 = vector.shape_cast %37 : vector<1x1x4x4xf32> to vector<4x4xf32>
    %cst_28 = arith.constant dense<0.000000e+00> : vector<128x4xf32>
    %39 = tpu.matmul %36, %38, %cst_28 {dimension_numbers = #tpu.dot_dimension_numbers<[1], [0], [0], [1], [0, 0, 1, 1], [], []>} : vector<128x4xf32>, vector<4x4xf32>, vector<128x4xf32> -> vector<128x4xf32>
    %40 = arith.addf %34, %39 : vector<128x4xf32>
    %41 = vector.extract_strided_slice %20 {offsets = [0, 1, 0], sizes = [10, 16, 4], strides = [1, 1, 1]} : vector<10x18x4xf32> to vector<10x16x4xf32>
    %42 = vector.extract_strided_slice %41 {offsets = [0, 0, 0], sizes = [8, 16, 4], strides = [1, 1, 1]} : vector<10x16x4xf32> to vector<8x16x4xf32>
    %43 = vector.shape_cast %42 : vector<8x16x4xf32> to vector<128x4xf32>
    %c0_29 = arith.constant 0 : index
    %c1_30 = arith.constant 1 : index
    %c0_31 = arith.constant 0 : index
    %c0_32 = arith.constant 0 : index
    %44 = vector.load %arg5[%c0_29, %c1_30, %c0_31, %c0_32] : memref<3x3x4x4xf32, #tpu.memory_space<vmem>>, vector<1x1x4x4xf32>
    %45 = vector.shape_cast %44 : vector<1x1x4x4xf32> to vector<4x4xf32>
    %cst_33 = arith.constant dense<0.000000e+00> : vector<128x4xf32>
    %46 = tpu.matmul %43, %45, %cst_33 {dimension_numbers = #tpu.dot_dimension_numbers<[1], [0], [0], [1], [0, 0, 1, 1], [], []>} : vector<128x4xf32>, vector<4x4xf32>, vector<128x4xf32> -> vector<128x4xf32>
    %47 = arith.addf %40, %46 : vector<128x4xf32>
    %48 = vector.extract_strided_slice %41 {offsets = [1, 0, 0], sizes = [8, 16, 4], strides = [1, 1, 1]} : vector<10x16x4xf32> to vector<8x16x4xf32>
    %49 = vector.shape_cast %48 : vector<8x16x4xf32> to vector<128x4xf32>
    %c1_34 = arith.constant 1 : index
    %c1_35 = arith.constant 1 : index
    %c0_36 = arith.constant 0 : index
    %c0_37 = arith.constant 0 : index
    %50 = vector.load %arg5[%c1_34, %c1_35, %c0_36, %c0_37] : memref<3x3x4x4xf32, #tpu.memory_space<vmem>>, vector<1x1x4x4xf32>
    %51 = vector.shape_cast %50 : vector<1x1x4x4xf32> to vector<4x4xf32>
    %cst_38 = arith.constant dense<0.000000e+00> : vector<128x4xf32>
    %52 = tpu.matmul %49, %51, %cst_38 {dimension_numbers = #tpu.dot_dimension_numbers<[1], [0], [0], [1], [0, 0, 1, 1], [], []>} : vector<128x4xf32>, vector<4x4xf32>, vector<128x4xf32> -> vector<128x4xf32>
    %53 = arith.addf %47, %52 : vector<128x4xf32>
    %54 = vector.extract_strided_slice %41 {offsets = [2, 0, 0], sizes = [8, 16, 4], strides = [1, 1, 1]} : vector<10x16x4xf32> to vector<8x16x4xf32>
    %55 = vector.shape_cast %54 : vector<8x16x4xf32> to vector<128x4xf32>
    %c2_39 = arith.constant 2 : index
    %c1_40 = arith.constant 1 : index
    %c0_41 = arith.constant 0 : index
    %c0_42 = arith.constant 0 : index
    %56 = vector.load %arg5[%c2_39, %c1_40, %c0_41, %c0_42] : memref<3x3x4x4xf32, #tpu.memory_space<vmem>>, vector<1x1x4x4xf32>
    %57 = vector.shape_cast %56 : vector<1x1x4x4xf32> to vector<4x4xf32>
    %cst_43 = arith.constant dense<0.000000e+00> : vector<128x4xf32>
    %58 = tpu.matmul %55, %57, %cst_43 {dimension_numbers = #tpu.dot_dimension_numbers<[1], [0], [0], [1], [0, 0, 1, 1], [], []>} : vector<128x4xf32>, vector<4x4xf32>, vector<128x4xf32> -> vector<128x4xf32>
    %59 = arith.addf %53, %58 : vector<128x4xf32>
    %60 = vector.extract_strided_slice %20 {offsets = [0, 2, 0], sizes = [10, 16, 4], strides = [1, 1, 1]} : vector<10x18x4xf32> to vector<10x16x4xf32>
    %61 = vector.extract_strided_slice %60 {offsets = [0, 0, 0], sizes = [8, 16, 4], strides = [1, 1, 1]} : vector<10x16x4xf32> to vector<8x16x4xf32>
    %62 = vector.shape_cast %61 : vector<8x16x4xf32> to vector<128x4xf32>
    %c0_44 = arith.constant 0 : index
    %c2_45 = arith.constant 2 : index
    %c0_46 = arith.constant 0 : index
    %c0_47 = arith.constant 0 : index
    %63 = vector.load %arg5[%c0_44, %c2_45, %c0_46, %c0_47] : memref<3x3x4x4xf32, #tpu.memory_space<vmem>>, vector<1x1x4x4xf32>
    %64 = vector.shape_cast %63 : vector<1x1x4x4xf32> to vector<4x4xf32>
    %cst_48 = arith.constant dense<0.000000e+00> : vector<128x4xf32>
    %65 = tpu.matmul %62, %64, %cst_48 {dimension_numbers = #tpu.dot_dimension_numbers<[1], [0], [0], [1], [0, 0, 1, 1], [], []>} : vector<128x4xf32>, vector<4x4xf32>, vector<128x4xf32> -> vector<128x4xf32>
    %66 = arith.addf %59, %65 : vector<128x4xf32>
    %67 = vector.extract_strided_slice %60 {offsets = [1, 0, 0], sizes = [8, 16, 4], strides = [1, 1, 1]} : vector<10x16x4xf32> to vector<8x16x4xf32>
    %68 = vector.shape_cast %67 : vector<8x16x4xf32> to vector<128x4xf32>
    %c1_49 = arith.constant 1 : index
    %c2_50 = arith.constant 2 : index
    %c0_51 = arith.constant 0 : index
    %c0_52 = arith.constant 0 : index
    %69 = vector.load %arg5[%c1_49, %c2_50, %c0_51, %c0_52] : memref<3x3x4x4xf32, #tpu.memory_space<vmem>>, vector<1x1x4x4xf32>
    %70 = vector.shape_cast %69 : vector<1x1x4x4xf32> to vector<4x4xf32>
    %cst_53 = arith.constant dense<0.000000e+00> : vector<128x4xf32>
    %71 = tpu.matmul %68, %70, %cst_53 {dimension_numbers = #tpu.dot_dimension_numbers<[1], [0], [0], [1], [0, 0, 1, 1], [], []>} : vector<128x4xf32>, vector<4x4xf32>, vector<128x4xf32> -> vector<128x4xf32>
    %72 = arith.addf %66, %71 : vector<128x4xf32>
    %73 = vector.extract_strided_slice %60 {offsets = [2, 0, 0], sizes = [8, 16, 4], strides = [1, 1, 1]} : vector<10x16x4xf32> to vector<8x16x4xf32>
    %74 = vector.shape_cast %73 : vector<8x16x4xf32> to vector<128x4xf32>
    %c2_54 = arith.constant 2 : index
    %c2_55 = arith.constant 2 : index
    %c0_56 = arith.constant 0 : index
    %c0_57 = arith.constant 0 : index
    %75 = vector.load %arg5[%c2_54, %c2_55, %c0_56, %c0_57] : memref<3x3x4x4xf32, #tpu.memory_space<vmem>>, vector<1x1x4x4xf32>
    %76 = vector.shape_cast %75 : vector<1x1x4x4xf32> to vector<4x4xf32>
    %cst_58 = arith.constant dense<0.000000e+00> : vector<128x4xf32>
    %77 = tpu.matmul %74, %76, %cst_58 {dimension_numbers = #tpu.dot_dimension_numbers<[1], [0], [0], [1], [0, 0, 1, 1], [], []>} : vector<128x4xf32>, vector<4x4xf32>, vector<128x4xf32> -> vector<128x4xf32>
    %78 = arith.addf %72, %77 : vector<128x4xf32>
    %79 = vector.shape_cast %78 : vector<128x4xf32> to vector<8x16x4xf32>
    %c0_59 = arith.constant 0 : index
    %c0_60 = arith.constant 0 : index
    %c0_61 = arith.constant 0 : index
    %c0_62 = arith.constant 0 : index
    %80 = vector.load %arg6[%c0_59, %c0_60, %c0_61, %c0_62] : memref<1x8x16x4xf32, #tpu.memory_space<vmem>>, vector<1x8x16x4xf32>
    %81 = vector.shape_cast %80 : vector<1x8x16x4xf32> to vector<8x16x4xf32>
    %82 = vector.shape_cast %79 : vector<8x16x4xf32> to vector<1x8x16x4xf32>
    tpu.vector_store %arg6[%c0_59, %c0_60, %c0_61, %c0_62], %82 {strides = array<i32>} : memref<1x8x16x4xf32, #tpu.memory_space<vmem>>, vector<1x8x16x4xf32>,
    %cst_63 = arith.constant dense<0.000000e+00> : vector<4xf32>
    %83 = vector.multi_reduction <add>, %78, %cst_63 [0] : vector<128x4xf32> to vector<4xf32>
    %84 = vector.shape_cast %83 : vector<4xf32> to vector<1x4xf32>
    %c0_64 = arith.constant 0 : index
    %c0_65 = arith.constant 0 : index
    %c0_66 = arith.constant 0 : index
    %c0_67 = arith.constant 0 : index
    %85 = vector.load %arg7[%c0_64, %c0_65, %c0_66, %c0_67] : memref<1x1x1x4xf32, #tpu.memory_space<vmem>>, vector<1x1x1x4xf32>
    %86 = vector.shape_cast %85 : vector<1x1x1x4xf32> to vector<1x4xf32>
    %87 = vector.shape_cast %84 : vector<1x4xf32> to vector<1x1x1x4xf32>
    tpu.vector_store %arg7[%c0_64, %c0_65, %c0_66, %c0_67], %87 {strides = array<i32>} : memref<1x1x1x4xf32, #tpu.memory_space<vmem>>, vector<1x1x1x4xf32>,
    %88 = arith.mulf %78, %78 : vector<128x4xf32>
    %cst_68 = arith.constant dense<0.000000e+00> : vector<4xf32>
    %89 = vector.multi_reduction <add>, %88, %cst_68 [0] : vector<128x4xf32> to vector<4xf32>
    %90 = vector.shape_cast %89 : vector<4xf32> to vector<1x4xf32>
    %c0_69 = arith.constant 0 : index
    %c0_70 = arith.constant 0 : index
    %c0_71 = arith.constant 0 : index
    %c0_72 = arith.constant 0 : index
    %91 = vector.load %arg8[%c0_69, %c0_70, %c0_71, %c0_72] : memref<1x1x1x4xf32, #tpu.memory_space<vmem>>, vector<1x1x1x4xf32>
    %92 = vector.shape_cast %91 : vector<1x1x1x4xf32> to vector<1x4xf32>
    %93 = vector.shape_cast %90 : vector<1x4xf32> to vector<1x1x1x4xf32>
    tpu.vector_store %arg8[%c0_69, %c0_70, %c0_71, %c0_72], %93 {strides = array<i32>} : memref<1x1x1x4xf32, #tpu.memory_space<vmem>>, vector<1x1x1x4xf32>,
    return
  }
  func.func @transform_0(%arg0: i32, %arg1: i32) -> (i32, i32, i32, i32) {
    %c0_i32 = arith.constant 0 : i32
    %c0_i32_0 = arith.constant 0 : i32
    %c0_i32_1 = arith.constant 0 : i32
    return %arg0, %arg1, %c0_i32, %c0_i32_0 : i32, i32, i32, i32
  }
  func.func @transform_1(%arg0: i32, %arg1: i32) -> (i32, i32, i32, i32) {
    %c8_i32 = arith.constant 8 : i32
    %0 = arith.muli %arg1, %c8_i32 : i32
    %c1_i32 = arith.constant 1 : i32
    %1 = arith.subi %0, %c1_i32 : i32
    %c0_i32 = arith.constant 0 : i32
    %2 = arith.maxsi %1, %c0_i32 : i32
    %c0_i32_0 = arith.constant 0 : i32
    %c0_i32_1 = arith.constant 0 : i32
    %c0_i32_2 = arith.constant 0 : i32
    return %arg0, %2, %c0_i32_0, %c0_i32_1 : i32, i32, i32, i32
  }
  func.func @transform_2(%arg0: i32, %arg1: i32) -> (i32, i32, i32, i32) {
    %c1_i32 = arith.constant 1 : i32
    %0 = arith.addi %arg1, %c1_i32 : i32
    %c8_i32 = arith.constant 8 : i32
    %1 = arith.muli %0, %c8_i32 : i32
    %c15_i32 = arith.constant 15 : i32
    %2 = arith.minsi %1, %c15_i32 : i32
    %c0_i32 = arith.constant 0 : i32
    %c0_i32_0 = arith.constant 0 : i32
    %c0_i32_1 = arith.constant 0 : i32
    return %arg0, %2, %c0_i32, %c0_i32_0 : i32, i32, i32, i32
  }
  func.func @transform_3(%arg0: i32, %arg1: i32) -> (i32, i32, i32, i32) {
    %c0_i32 = arith.constant 0 : i32
    %c0_i32_0 = arith.constant 0 : i32
    %c0_i32_1 = arith.constant 0 : i32
    %c0_i32_2 = arith.constant 0 : i32
    %c0_i32_3 = arith.constant 0 : i32
    return %c0_i32, %c0_i32_0, %c0_i32_1, %c0_i32_2 : i32, i32, i32, i32
  }
  func.func @transform_4(%arg0: i32, %arg1: i32) -> (i32, i32, i32, i32) {
    %c0_i32 = arith.constant 0 : i32
    %c0_i32_0 = arith.constant 0 : i32
    %c0_i32_1 = arith.constant 0 : i32
    return %arg0, %arg1, %c0_i32, %c0_i32_0 : i32, i32, i32, i32
  }
  func.func @transform_5(%arg0: i32, %arg1: i32) -> (i32, i32, i32, i32) {
    %c0_i32 = arith.constant 0 : i32
    %c0_i32_0 = arith.constant 0 : i32
    %c0_i32_1 = arith.constant 0 : i32
    return %arg0, %arg1, %c0_i32, %c0_i32_0 : i32, i32, i32, i32
  }
  func.func @transform_6(%arg0: i32, %arg1: i32) -> (i32, i32, i32, i32) {
    %c0_i32 = arith.constant 0 : i32
    %c0_i32_0 = arith.constant 0 : i32
    %c0_i32_1 = arith.constant 0 : i32
    return %arg0, %arg1, %c0_i32, %c0_i32_0 : i32, i32, i32, i32
  }
}

module attributes {stable_mosaic.version = 11 : i64} {
  func.func @_bn_relu_conv1x1_stats_kernel(%arg0: i32, %arg1: memref<128x4xf32, #tpu.memory_space<vmem>>, %arg2: memref<1x4xf32, #tpu.memory_space<vmem>>, %arg3: memref<1x4xf32, #tpu.memory_space<vmem>>, %arg4: memref<4x4xf32, #tpu.memory_space<vmem>>, %arg5: memref<128x4xf32, #tpu.memory_space<vmem>>, %arg6: memref<1x1x4xf32, #tpu.memory_space<vmem>>, %arg7: memref<1x1x4xf32, #tpu.memory_space<vmem>>) attributes {dimension_semantics = [#tpu.dimension_semantics<parallel>], iteration_bounds = array<i64: 4>, scalar_prefetch = 0 : i64, scratch_operands = 0 : i64, tpu.core_type = #tpu.core_type<tc>, window_params = [{transform_indices = @transform_0, window_bounds = array<i64: 128, 4>}, {pipeline_mode = #tpu.pipeline_mode<synchronous>, transform_indices = @transform_1, window_bounds = array<i64: 1, 4>}, {pipeline_mode = #tpu.pipeline_mode<synchronous>, transform_indices = @transform_2, window_bounds = array<i64: 1, 4>}, {pipeline_mode = #tpu.pipeline_mode<synchronous>, transform_indices = @transform_3, window_bounds = array<i64: 4, 4>}, {transform_indices = @transform_4, window_bounds = array<i64: 128, 4>}, {transform_indices = @transform_5, window_bounds = array<i64: 1, 1, 4>}, {transform_indices = @transform_6, window_bounds = array<i64: 1, 1, 4>}]} {
    %c0 = arith.constant 0 : index
    %c0_0 = arith.constant 0 : index
    %0 = vector.load %arg1[%c0, %c0_0] : memref<128x4xf32, #tpu.memory_space<vmem>>, vector<128x4xf32>
    %c0_1 = arith.constant 0 : index
    %c0_2 = arith.constant 0 : index
    %1 = vector.load %arg2[%c0_1, %c0_2] : memref<1x4xf32, #tpu.memory_space<vmem>>, vector<1x4xf32>
    %2 = vector.broadcast %1 : vector<1x4xf32> to vector<128x4xf32>
    %3 = arith.mulf %0, %2 : vector<128x4xf32>
    %c0_3 = arith.constant 0 : index
    %c0_4 = arith.constant 0 : index
    %4 = vector.load %arg3[%c0_3, %c0_4] : memref<1x4xf32, #tpu.memory_space<vmem>>, vector<1x4xf32>
    %5 = vector.broadcast %4 : vector<1x4xf32> to vector<128x4xf32>
    %6 = arith.addf %3, %5 : vector<128x4xf32>
    %cst = arith.constant 0.000000e+00 : f32
    %7 = vector.broadcast %cst : f32 to vector<128x4xf32>
    %8 = arith.maximumf %6, %7 : vector<128x4xf32>
    %c0_5 = arith.constant 0 : index
    %c0_6 = arith.constant 0 : index
    %9 = vector.load %arg4[%c0_5, %c0_6] : memref<4x4xf32, #tpu.memory_space<vmem>>, vector<4x4xf32>
    %cst_7 = arith.constant dense<0.000000e+00> : vector<128x4xf32>
    %10 = tpu.matmul %8, %9, %cst_7 {dimension_numbers = #tpu.dot_dimension_numbers<[1], [0], [0], [1], [0, 0, 1, 1], [], []>} : vector<128x4xf32>, vector<4x4xf32>, vector<128x4xf32> -> vector<128x4xf32>
    %c0_8 = arith.constant 0 : index
    %c0_9 = arith.constant 0 : index
    %11 = vector.load %arg5[%c0_8, %c0_9] : memref<128x4xf32, #tpu.memory_space<vmem>>, vector<128x4xf32>
    tpu.vector_store %arg5[%c0_8, %c0_9], %10 {strides = array<i32>} : memref<128x4xf32, #tpu.memory_space<vmem>>, vector<128x4xf32>,
    %cst_10 = arith.constant dense<0.000000e+00> : vector<4xf32>
    %12 = vector.multi_reduction <add>, %10, %cst_10 [0] : vector<128x4xf32> to vector<4xf32>
    %13 = vector.shape_cast %12 : vector<4xf32> to vector<1x4xf32>
    %c0_11 = arith.constant 0 : index
    %c0_12 = arith.constant 0 : index
    %c0_13 = arith.constant 0 : index
    %14 = vector.load %arg6[%c0_11, %c0_12, %c0_13] : memref<1x1x4xf32, #tpu.memory_space<vmem>>, vector<1x1x4xf32>
    %15 = vector.shape_cast %14 : vector<1x1x4xf32> to vector<1x4xf32>
    %16 = vector.shape_cast %13 : vector<1x4xf32> to vector<1x1x4xf32>
    tpu.vector_store %arg6[%c0_11, %c0_12, %c0_13], %16 {strides = array<i32>} : memref<1x1x4xf32, #tpu.memory_space<vmem>>, vector<1x1x4xf32>,
    %17 = arith.mulf %10, %10 : vector<128x4xf32>
    %cst_14 = arith.constant dense<0.000000e+00> : vector<4xf32>
    %18 = vector.multi_reduction <add>, %17, %cst_14 [0] : vector<128x4xf32> to vector<4xf32>
    %19 = vector.shape_cast %18 : vector<4xf32> to vector<1x4xf32>
    %c0_15 = arith.constant 0 : index
    %c0_16 = arith.constant 0 : index
    %c0_17 = arith.constant 0 : index
    %20 = vector.load %arg7[%c0_15, %c0_16, %c0_17] : memref<1x1x4xf32, #tpu.memory_space<vmem>>, vector<1x1x4xf32>
    %21 = vector.shape_cast %20 : vector<1x1x4xf32> to vector<1x4xf32>
    %22 = vector.shape_cast %19 : vector<1x4xf32> to vector<1x1x4xf32>
    tpu.vector_store %arg7[%c0_15, %c0_16, %c0_17], %22 {strides = array<i32>} : memref<1x1x4xf32, #tpu.memory_space<vmem>>, vector<1x1x4xf32>,
    return
  }
  func.func @transform_0(%arg0: i32) -> (i32, i32) {
    %c0_i32 = arith.constant 0 : i32
    %c0_i32_0 = arith.constant 0 : i32
    return %arg0, %c0_i32 : i32, i32
  }
  func.func @transform_1(%arg0: i32) -> (i32, i32) {
    %c0_i32 = arith.constant 0 : i32
    %c0_i32_0 = arith.constant 0 : i32
    %c0_i32_1 = arith.constant 0 : i32
    return %c0_i32, %c0_i32_0 : i32, i32
  }
  func.func @transform_2(%arg0: i32) -> (i32, i32) {
    %c0_i32 = arith.constant 0 : i32
    %c0_i32_0 = arith.constant 0 : i32
    %c0_i32_1 = arith.constant 0 : i32
    return %c0_i32, %c0_i32_0 : i32, i32
  }
  func.func @transform_3(%arg0: i32) -> (i32, i32) {
    %c0_i32 = arith.constant 0 : i32
    %c0_i32_0 = arith.constant 0 : i32
    %c0_i32_1 = arith.constant 0 : i32
    return %c0_i32, %c0_i32_0 : i32, i32
  }
  func.func @transform_4(%arg0: i32) -> (i32, i32) {
    %c0_i32 = arith.constant 0 : i32
    %c0_i32_0 = arith.constant 0 : i32
    return %arg0, %c0_i32 : i32, i32
  }
  func.func @transform_5(%arg0: i32) -> (i32, i32, i32) {
    %c0_i32 = arith.constant 0 : i32
    %c0_i32_0 = arith.constant 0 : i32
    %c0_i32_1 = arith.constant 0 : i32
    return %arg0, %c0_i32, %c0_i32_0 : i32, i32, i32
  }
  func.func @transform_6(%arg0: i32) -> (i32, i32, i32) {
    %c0_i32 = arith.constant 0 : i32
    %c0_i32_0 = arith.constant 0 : i32
    %c0_i32_1 = arith.constant 0 : i32
    return %arg0, %c0_i32, %c0_i32_0 : i32, i32, i32
  }
}

module attributes {stable_mosaic.version = 11 : i64} {
  func.func @_bn_residual_kernel(%arg0: i32, %arg1: memref<128x4xf32, #tpu.memory_space<vmem>>, %arg2: memref<128x4xf32, #tpu.memory_space<vmem>>, %arg3: memref<1x4xf32, #tpu.memory_space<vmem>>, %arg4: memref<1x4xf32, #tpu.memory_space<vmem>>, %arg5: memref<128x4xf32, #tpu.memory_space<vmem>>) attributes {dimension_semantics = [#tpu.dimension_semantics<parallel>], iteration_bounds = array<i64: 4>, scalar_prefetch = 0 : i64, scratch_operands = 0 : i64, tpu.core_type = #tpu.core_type<tc>, window_params = [{transform_indices = @transform_0, window_bounds = array<i64: 128, 4>}, {transform_indices = @transform_1, window_bounds = array<i64: 128, 4>}, {pipeline_mode = #tpu.pipeline_mode<synchronous>, transform_indices = @transform_2, window_bounds = array<i64: 1, 4>}, {pipeline_mode = #tpu.pipeline_mode<synchronous>, transform_indices = @transform_3, window_bounds = array<i64: 1, 4>}, {transform_indices = @transform_4, window_bounds = array<i64: 128, 4>}]} {
    %c0 = arith.constant 0 : index
    %c0_0 = arith.constant 0 : index
    %0 = vector.load %arg2[%c0, %c0_0] : memref<128x4xf32, #tpu.memory_space<vmem>>, vector<128x4xf32>
    %c0_1 = arith.constant 0 : index
    %c0_2 = arith.constant 0 : index
    %1 = vector.load %arg1[%c0_1, %c0_2] : memref<128x4xf32, #tpu.memory_space<vmem>>, vector<128x4xf32>
    %c0_3 = arith.constant 0 : index
    %c0_4 = arith.constant 0 : index
    %2 = vector.load %arg3[%c0_3, %c0_4] : memref<1x4xf32, #tpu.memory_space<vmem>>, vector<1x4xf32>
    %3 = vector.broadcast %2 : vector<1x4xf32> to vector<128x4xf32>
    %4 = arith.mulf %1, %3 : vector<128x4xf32>
    %5 = arith.addf %0, %4 : vector<128x4xf32>
    %c0_5 = arith.constant 0 : index
    %c0_6 = arith.constant 0 : index
    %6 = vector.load %arg4[%c0_5, %c0_6] : memref<1x4xf32, #tpu.memory_space<vmem>>, vector<1x4xf32>
    %7 = vector.broadcast %6 : vector<1x4xf32> to vector<128x4xf32>
    %8 = arith.addf %5, %7 : vector<128x4xf32>
    %c0_7 = arith.constant 0 : index
    %c0_8 = arith.constant 0 : index
    %9 = vector.load %arg5[%c0_7, %c0_8] : memref<128x4xf32, #tpu.memory_space<vmem>>, vector<128x4xf32>
    tpu.vector_store %arg5[%c0_7, %c0_8], %8 {strides = array<i32>} : memref<128x4xf32, #tpu.memory_space<vmem>>, vector<128x4xf32>,
    return
  }
  func.func @transform_0(%arg0: i32) -> (i32, i32) {
    %c0_i32 = arith.constant 0 : i32
    %c0_i32_0 = arith.constant 0 : i32
    return %arg0, %c0_i32 : i32, i32
  }
  func.func @transform_1(%arg0: i32) -> (i32, i32) {
    %c0_i32 = arith.constant 0 : i32
    %c0_i32_0 = arith.constant 0 : i32
    return %arg0, %c0_i32 : i32, i32
  }
  func.func @transform_2(%arg0: i32) -> (i32, i32) {
    %c0_i32 = arith.constant 0 : i32
    %c0_i32_0 = arith.constant 0 : i32
    %c0_i32_1 = arith.constant 0 : i32
    return %c0_i32, %c0_i32_0 : i32, i32
  }
  func.func @transform_3(%arg0: i32) -> (i32, i32) {
    %c0_i32 = arith.constant 0 : i32
    %c0_i32_0 = arith.constant 0 : i32
    %c0_i32_1 = arith.constant 0 : i32
    return %c0_i32, %c0_i32_0 : i32, i32
  }
  func.func @transform_4(%arg0: i32) -> (i32, i32) {
    %c0_i32 = arith.constant 0 : i32
    %c0_i32_0 = arith.constant 0 : i32
    return %arg0, %c0_i32 : i32, i32
  }
}

</mosaic_0001>

<bundles_post_ra>
// kernel: resblock_forward.5
= control target key start
LH: loop header
LB: loop body
LE: loop exit
PB: predicated region body
PF: predicated region fallthrough
CT: control target
= control target key end

     0   :  { %s458_s15 = smov 0   ;;  %s590_s0 = inlined_call_operand.vmem [shape: f32[512,4], index: 0, kind: input, shape index: {}]   ;;  %s591_s1 = inlined_call_operand.vmem [shape: f32[512,4], index: 1, kind: input, shape index: {}]   ;;  %s592_s2 = inlined_call_operand.vmem [shape: f32[1,4], index: 2, kind: input, shape index: {}]   ;;  %s593_s3 = inlined_call_operand.vmem [shape: f32[1,4], index: 3, kind: input, shape index: {}]   ;;  %s594_s4 = inlined_call_operand.vmem [shape: f32[512,4], index: 4, kind: output, shape index: {}]  }
   0x1 LB: > { %s402_s16 = sadd.s32 4294967295, %s431_s15   ;;  %p406_p0 = scmp.ge.s32.totalorder %s431_s15, 1  ;;  %s431_s15 = sphi %s458_s15, %s14_s15  }
   0x2   : > { %p174_p1 = scmp.lt.s32.totalorder %s431_s15, 5 }
   0x4   : > { %p175_p2 = pnand %p406_p0, %p174_p1 }
   0x5   : > { %s407_s17 = sshll.u32 (!%p175_p2), %s402_s16, 4  ;;  %v469_v0 = vld [vmem:[%s592_s2] ss:$0 sm:$0xff] (!%p175_p2)  ;;  %vm317_vm0 = vcmask (!%p175_p2), 31744  }
   0x6   : > { %178 = sbr.rel (%p175_p2) target bundleno = 37 (0x25), region = 36  ;;  %p206_p3 = scmp.lt.s32.totalorder (!%p175_p2), %s407_s17, 63  ;;  %v486_v3 = vld [vmem:[%s593_s3] ss:$0 sm:$0xff] (!%p175_p2) }
   0xd   : > { %s596_s17 = smov (!%p206_p3, %s407_s17), 63 }
   0xe   : > { %s408_s18 = sshll.u32 %s596_s17, 3 }
   0xf   : > { %s474_s23 = scalar_lea.vmem %s590_s0, %s408_s18  ;;  %s479_s26 = scalar_lea.vmem %s591_s1, %s408_s18 }
  0x10   : > { %v223_v1 = vld [vmem:[%s479_s26] sm:$0xff]  ;;  %v224_v4 = vld [vmem:[%s479_s26 + $0x8] sm:$0xff]  ;;  %v225_v7 = vld [vmem:[%s479_s26 + $0x10] sm:$0xff]  ;;  %s505_s5 = scalar_lea.vmem %s594_s4, %s408_s18 }
  0x11   : > { %v239_v2 = vld [vmem:[%s474_s23] sm:$0xff]  ;;  %v240_v6 = vld [vmem:[%s474_s23 + $0x8] sm:$0xff]  ;;  %v241_v8 = vld [vmem:[%s474_s23 + $0x10] sm:$0xff] }
  0x12   : > { %v262_v5 = vmul.f32 %v469_v0, %v239_v2  ;;  %v263_v9 = vmul.f32 %v469_v0, %v240_v6  ;;  %v264_v10 = vmul.f32 %v469_v0, %v241_v8  ;;  %v226_v11 = vld [vmem:[%s479_s26 + $0x18] sm:$0xff]  ;;  %v227_v13 = vld [vmem:[%s479_s26 + $0x20] sm:$0xff]  ;;  %v228_v17 = vld [vmem:[%s479_s26 + $0x28] sm:$0xff] }
  0x13   : > { %v242_v12 = vld [vmem:[%s474_s23 + $0x18] sm:$0xff]  ;;  %v243_v16 = vld [vmem:[%s474_s23 + $0x20] sm:$0xff]  ;;  %v244_v18 = vld [vmem:[%s474_s23 + $0x28] sm:$0xff] }
  0x14   : > { %v278_v14 = vadd.f32 %v262_v5, %v223_v1  ;;  %v265_v15 = vmul.f32 %v469_v0, %v242_v12  ;;  %v279_v19 = vadd.f32 %v263_v9, %v224_v4  ;;  %v280_v20 = vadd.f32 %v264_v10, %v225_v7  ;;  %v229_v23 = vld [vmem:[%s479_s26 + $0x30] sm:$0xff]  ;;  %v230_v28 = vld [vmem:[%s479_s26 + $0x38] sm:$0xff]  ;;  %v247_v30 = vld [vmem:[%s474_s23 + $0x40] sm:$0xff] }
  0x15   : > { %v266_v21 = vmul.f32 %v469_v0, %v243_v16  ;;  %v267_v22 = vmul.f32 %v469_v0, %v244_v18  ;;  %v245_v24 = vld [vmem:[%s474_s23 + $0x30] sm:$0xff]  ;;  %v246_v29 = vld [vmem:[%s474_s23 + $0x38] sm:$0xff]  ;;  %v231_v35 = vld [vmem:[%s479_s26 + $0x40] sm:$0xff]  ;;  %v270_v41 = vmul.f32 %v469_v0, %v247_v30 }
  0x16   : > { %v301_v25 = vadd.f32 %v486_v3, %v278_v14  ;;  %v281_v26 = vadd.f32 %v265_v15, %v226_v11  ;;  %v268_v27 = vmul.f32 %v469_v0, %v245_v24  ;;  %v302_v31 = vadd.f32 %v486_v3, %v279_v19  ;;  %v232_v36 = vld [vmem:[%s479_s26 + $0x48] sm:$0xff]  ;;  %v233_v42 = vld [vmem:[%s479_s26 + $0x50] sm:$0xff]  ;;  %v250_v44 = vld [vmem:[%s474_s23 + $0x58] sm:$0xff] }
  0x17   : > { %v303_v32 = vadd.f32 %v486_v3, %v280_v20  ;;  %v282_v33 = vadd.f32 %v266_v21, %v227_v13  ;;  %v283_v34 = vadd.f32 %v267_v22, %v228_v17  ;;  %v248_v37 = vld [vmem:[%s474_s23 + $0x48] sm:$0xff]  ;;  %v269_v40 = vmul.f32 %v469_v0, %v246_v29  ;;  %v249_v43 = vld [vmem:[%s474_s23 + $0x50] sm:$0xff]  ;;  %v234_v49 = vld [vmem:[%s479_s26 + $0x58] sm:$0xff] }
  0x18   : > { %318 = vst.msk [vmem:[%s505_s5] sm:$0xff] %vm317_vm0, %v301_v25  ;;  %v304_v38 = vadd.f32 %v486_v3, %v281_v26  ;;  %v284_v39 = vadd.f32 %v268_v27, %v229_v23  ;;  %319 = vst.msk [vmem:[%s505_s5 + $0x8] sm:$0xff] %vm317_vm0, %v302_v31  ;;  %v271_v47 = vmul.f32 %v469_v0, %v248_v37  ;;  %v235_v50 = vld [vmem:[%s479_s26 + $0x60] sm:$0xff]  ;;  %v236_v56 = vld [vmem:[%s479_s26 + $0x68] sm:$0xff] }
  0x19   : > { %320 = vst.msk [vmem:[%s505_s5 + $0x10] sm:$0xff] %vm317_vm0, %v303_v32  ;;  %v305_v45 = vadd.f32 %v486_v3, %v282_v33  ;;  %v306_v46 = vadd.f32 %v486_v3, %v283_v34  ;;  %v272_v48 = vmul.f32 %v469_v0, %v249_v43  ;;  %v251_v51 = vld [vmem:[%s474_s23 + $0x60] sm:$0xff]  ;;  %v285_v53 = vadd.f32 %v269_v40, %v230_v28  ;;  %v252_v57 = vld [vmem:[%s474_s23 + $0x68] sm:$0xff]  ;;  %v253_v58 = vld [vmem:[%s474_s23 + $0x70] sm:$0xff] }
  0x1a   : > { %321 = vst.msk [vmem:[%s505_s5 + $0x18] sm:$0xff] %vm317_vm0, %v304_v38  ;;  %v307_v52 = vadd.f32 %v486_v3, %v284_v39  ;;  %v286_v54 = vadd.f32 %v270_v41, %v231_v35  ;;  %v273_v55 = vmul.f32 %v469_v0, %v250_v44  ;;  %v287_v59 = vadd.f32 %v271_v47, %v232_v36  ;;  %v237_v63 = vld [vmem:[%s479_s26 + $0x70] sm:$0xff]  ;;  %v254_v1 = vld [vmem:[%s474_s23 + $0x78] sm:$0xff] }
  0x1b   : > { %322 = vst.msk [vmem:[%s505_s5 + $0x20] sm:$0xff] %vm317_vm0, %v305_v45  ;;  %323 = vst.msk [vmem:[%s505_s5 + $0x28] sm:$0xff] %vm317_vm0, %v306_v46  ;;  %v288_v60 = vadd.f32 %v272_v48, %v233_v42  ;;  %v274_v61 = vmul.f32 %v469_v0, %v251_v51  ;;  %v275_v62 = vmul.f32 %v469_v0, %v252_v57  ;;  %v238_v11 = vld [vmem:[%s479_s26 + $0x78] sm:$0xff] }
  0x1c   : > { %324 = vst.msk [vmem:[%s505_s5 + $0x30] sm:$0xff] %vm317_vm0, %v307_v52  ;;  %v308_v2 = vadd.f32 %v486_v3, %v285_v53  ;;  %v309_v4 = vadd.f32 %v486_v3, %v286_v54  ;;  %v289_v5 = vadd.f32 %v273_v55, %v234_v49  ;;  %v276_v6 = vmul.f32 %v469_v0, %v253_v58 }
  0x1d   : > { %v310_v7 = vadd.f32 %v486_v3, %v287_v59  ;;  %v311_v8 = vadd.f32 %v486_v3, %v288_v60  ;;  %v290_v9 = vadd.f32 %v274_v61, %v235_v50  ;;  %v291_v10 = vadd.f32 %v275_v62, %v236_v56 }
  0x1e   : > { %325 = vst.msk [vmem:[%s505_s5 + $0x38] sm:$0xff] %vm317_vm0, %v308_v2  ;;  %326 = vst.msk [vmem:[%s505_s5 + $0x40] sm:$0xff] %vm317_vm0, %v309_v4  ;;  %v312_v12 = vadd.f32 %v486_v3, %v289_v5  ;;  %v292_v13 = vadd.f32 %v276_v6, %v237_v63  ;;  %v277_v14 = vmul.f32 %v469_v0, %v254_v1 }
  0x1f   : > { %327 = vst.msk [vmem:[%s505_s5 + $0x48] sm:$0xff] %vm317_vm0, %v310_v7  ;;  %328 = vst.msk [vmem:[%s505_s5 + $0x50] sm:$0xff] %vm317_vm0, %v311_v8  ;;  %v313_v15 = vadd.f32 %v486_v3, %v290_v9  ;;  %v314_v16 = vadd.f32 %v486_v3, %v291_v10 }
  0x20   : > { %329 = vst.msk [vmem:[%s505_s5 + $0x58] sm:$0xff] %vm317_vm0, %v312_v12  ;;  %v315_v17 = vadd.f32 %v486_v3, %v292_v13  ;;  %v293_v18 = vadd.f32 %v277_v14, %v238_v11 }
  0x21   : > { %330 = vst.msk [vmem:[%s505_s5 + $0x60] sm:$0xff] %vm317_vm0, %v313_v15  ;;  %331 = vst.msk [vmem:[%s505_s5 + $0x68] sm:$0xff] %vm317_vm0, %v314_v16 }
  0x22   : > { %332 = vst.msk [vmem:[%s505_s5 + $0x70] sm:$0xff] %vm317_vm0, %v315_v17  ;;  %v316_v0 = vadd.f32 %v486_v3, %v293_v18 }
  0x24   : > { %333 = vst.msk [vmem:[%s505_s5 + $0x78] sm:$0xff] %vm317_vm0, %v316_v0 }
  0x25 PF: > { %s14_s15 = sadd.s32 1, %s431_s15  }
  0x26   : > { %p11_p4 = scmp.ge.s32.totalorder %s14_s15, 6  }
  0x28   :  { %13 = sbr.rel (!%p11_p4) target bundleno = 1 (0x1), region = 69 }

// kernel: resblock_forward.4
= control target key start
LH: loop header
LB: loop body
LE: loop exit
PB: predicated region body
PF: predicated region fallthrough
CT: control target
= control target key end

     0   :  { %s890_s21 = smov 0   ;;  %s1070_s0 = inlined_call_operand.vmem [shape: f32[512,4], index: 0, kind: input, shape index: {}]   ;;  %s1071_s1 = inlined_call_operand.vmem [shape: f32[1,4], index: 1, kind: input, shape index: {}]   ;;  %s1072_s2 = inlined_call_operand.vmem [shape: f32[1,4], index: 2, kind: input, shape index: {}]   ;;  %s1073_s3 = inlined_call_operand.vmem [shape: f32[4,4], index: 3, kind: input, shape index: {}]   ;;  %s1074_s4 = inlined_call_operand.vmem [shape: f32[512,4], index: 4, kind: output, shape index: {0}]   ;;  %s1075_s5 = inlined_call_operand.vmem [shape: f32[4,1,4], index: 5, kind: output, shape index: {1}]   ;;  %s1076_s6 = inlined_call_operand.vmem [shape: f32[4,1,4], index: 6, kind: output, shape index: {2}]  }
   0x1 LB: > { %s896_s22 = sadd.s32 4294967295, %s853_s21   ;;  %p768_p0 = scmp.ge.s32.totalorder %s853_s21, 1  ;;  %s853_s21 = sphi %s890_s21, %s17_s21  }
   0x2   : > { %p218_p1 = scmp.lt.s32.totalorder %s853_s21, 5 }
   0x4   : > { %p219_p2 = pnand %p768_p0, %p218_p1 }
   0x5   : > { %v350_v0 = vld [vmem:[%s1073_s3] sm:$0xf] (!%p219_p2)  ;;  %vm400_vm0 = vcmask (!%p219_p2), 1043456   ;;  %s769_s25 = sshll.u32 (!%p219_p2), %s896_s22, 4  ;;  %vm351_vm1 = vcmask (!%p219_p2), 31744   ;;  %p266_p4 = scmp.lt.s32.totalorder (!%p219_p2), %s896_s22, 3 }
   0x6   : > { %222 = sbr.rel (%p219_p2) target bundleno = 285 (0x11d), region = 36  ;;  %811 = vmatprep.subr.msk.mxu0 (!%p219_p2), %vm400_vm0, %v350_v0  ;;  %p255_p3 = scmp.lt.s32.totalorder (!%p219_p2), %s769_s25, 63  ;;  %837 = vmatprep.subr.msk.mxu1 (!%p219_p2), %vm400_vm0, %v350_v0  ;;  %v910_v1 = vld [vmem:[%s1071_s1] ss:$0 sm:$0xff] (!%p219_p2)  ;;  %vm602_vm2 = vcmask (!%p219_p2), 24576  }
   0x7   : > { %812 = vmatpush3.msk.msra.mxu0 (!%p219_p2), %vm400_vm0, %v350_v0  ;;  %838 = vmatpush3.msk.msra.mxu1 (!%p219_p2), %vm400_vm0, %v350_v0  ;;  %v922_v2 = vld [vmem:[%s1072_s2] ss:$0 sm:$0xff] (!%p219_p2) }
   0xd   : > { %s1078_s25 = smov (!%p255_p3, %s769_s25), 63  ;;  %s1080_s22 = smov (!%p266_p4, %s896_s22), 3 }
   0xe   : > { %s770_s26 = sshll.u32 %s1078_s25, 3  ;;  %s268_s15 = scalar_lea.vmem %s1075_s5, %s1080_s22 }
   0xf   : > { %s917_s7 = scalar_lea.vmem %s1070_s0, %s770_s26  ;;  %s993_s12 = scalar_lea.vmem %s1074_s4, %s770_s26 }
  0x10   : > { %v272_v3 = vld [vmem:[%s917_s7] sm:$0xff]  ;;  %v273_v4 = vld [vmem:[%s917_s7 + $0x8] sm:$0xff]  ;;  %v274_v5 = vld [vmem:[%s917_s7 + $0x10] sm:$0xff]  ;;  %s271_s18 = scalar_lea.vmem %s1076_s6, %s1080_s22 }
  0x11   : > { %v295_v6 = vmul.f32 %v910_v1, %v272_v3  ;;  %v296_v7 = vmul.f32 %v910_v1, %v273_v4  ;;  %v297_v8 = vmul.f32 %v910_v1, %v274_v5  ;;  %v275_v9 = vld [vmem:[%s917_s7 + $0x18] sm:$0xff]  ;;  %v276_v10 = vld [vmem:[%s917_s7 + $0x20] sm:$0xff]  ;;  %v277_v11 = vld [vmem:[%s917_s7 + $0x28] sm:$0xff] }
  0x12   : > { %v298_v12 = vmul.f32 %v910_v1, %v275_v9  ;;  %v299_v13 = vmul.f32 %v910_v1, %v276_v10  ;;  %v300_v14 = vmul.f32 %v910_v1, %v277_v11  ;;  %v278_v15 = vld [vmem:[%s917_s7 + $0x30] sm:$0xff]  ;;  %v279_v19 = vld [vmem:[%s917_s7 + $0x38] sm:$0xff]  ;;  %v280_v22 = vld [vmem:[%s917_s7 + $0x40] sm:$0xff] }
  0x13   : > { %v318_v16 = vadd.f32 %v922_v2, %v295_v6  ;;  %v319_v17 = vadd.f32 %v922_v2, %v296_v7  ;;  %v320_v18 = vadd.f32 %v922_v2, %v297_v8  ;;  %v301_v21 = vmul.f32 %v910_v1, %v278_v15  ;;  %v281_v23 = vld [vmem:[%s917_s7 + $0x48] sm:$0xff]  ;;  %v282_v24 = vld [vmem:[%s917_s7 + $0x50] sm:$0xff]  ;;  %v283_v29 = vld [vmem:[%s917_s7 + $0x58] sm:$0xff] }
  0x14   : > { %v321_v20 = vadd.f32 %v922_v2, %v298_v12  ;;  %v322_v28 = vadd.f32 %v922_v2, %v299_v13  ;;  %v284_v30 = vld [vmem:[%s917_s7 + $0x60] sm:$0xff]  ;;  %v323_v31 = vadd.f32 %v922_v2, %v300_v14  ;;  %v302_v32 = vmul.f32 %v910_v1, %v279_v19  ;;  %v285_v36 = vld [vmem:[%s917_s7 + $0x68] sm:$0xff]  ;;  %v286_v37 = vld [vmem:[%s917_s7 + $0x70] sm:$0xff] }
  0x15   : > { %v334_v25 = vmax.f32 %v318_v16, 0.0  ;;  %v335_v26 = vmax.f32 %v319_v17, 0.0  ;;  %v336_v27 = vmax.f32 %v320_v18, 0.0  ;;  %v303_v33 = vmul.f32 %v910_v1, %v280_v22  ;;  %v287_v53 = vld [vmem:[%s917_s7 + $0x78] sm:$0xff] }
  0x16   : > { %v304_v34 = vmul.f32 %v910_v1, %v281_v23  ;;  %v305_v35 = vmul.f32 %v910_v1, %v282_v24  ;;  %v337_v38 = vmax.f32 %v321_v20, 0.0  ;;  %v324_v39 = vadd.f32 %v922_v2, %v301_v21 }
  0x17   : > { %813 = vmatprep.mubr.msk.f32.mxu0 %vm351_vm1, %v334_v25  ;;  %v306_v40 = vmul.f32 %v910_v1, %v283_v29  ;;  %v307_v41 = vmul.f32 %v910_v1, %v284_v30  ;;  %v338_v42 = vmax.f32 %v322_v28, 0.0  ;;  %v326_v43 = vadd.f32 %v922_v2, %v303_v33 }
  0x18   : > { %814 = vmatmul.mubr.msk.f32.vlgmr.msra.gmra.mrb[0].mxu0 %vm351_vm1, %v335_v26  ;;  %v327_v44 = vadd.f32 %v922_v2, %v304_v34  ;;  %v328_v45 = vadd.f32 %v922_v2, %v305_v35  ;;  %v308_v47 = vmul.f32 %v910_v1, %v285_v36  ;;  %v309_v48 = vmul.f32 %v910_v1, %v286_v37 }
  0x19   : > { %816 = vmatprep.mubr.msk.f32.mxu0 %vm351_vm1, %v336_v27  ;;  %v329_v46 = vadd.f32 %v922_v2, %v306_v40  ;;  %v342_v49 = vmax.f32 %v326_v43, 0.0  ;;  %v330_v52 = vadd.f32 %v922_v2, %v307_v41  ;;  %v339_v54 = vmax.f32 %v323_v31, 0.0 }
  0x1a   : > { %v343_v50 = vmax.f32 %v327_v44, 0.0  ;;  %v344_v51 = vmax.f32 %v328_v45, 0.0  ;;  %v325_v55 = vadd.f32 %v922_v2, %v302_v32  ;;  %v340_v56 = vmax.f32 %v324_v39, 0.0 }
  0x1b   : > { %825 = vmatprep.mubr.msk.f32.mxu1 %vm351_vm1, %v342_v49  ;;  %v345_v57 = vmax.f32 %v329_v46, 0.0  ;;  %v331_v58 = vadd.f32 %v922_v2, %v308_v47  ;;  %v310_v59 = vmul.f32 %v910_v1, %v287_v53  ;;  %v346_v60 = vmax.f32 %v330_v52, 0.0 }
  0x1c   : > { %817 = vmatmul.mubr.msk.f32.gmra.mrb[2].mxu0 %vm351_vm1, %v337_v38  ;;  %826 = vmatmul.mubr.msk.f32.vlgmr.msra.gmra.mrb[0].mxu1 %vm351_vm1, %v343_v50  ;;  %v332_v61 = vadd.f32 %v922_v2, %v309_v48  ;;  %v341_v62 = vmax.f32 %v325_v55, 0.0 }
  0x1d   : > { %819 = vmatprep.mubr.msk.f32.mxu0 %vm351_vm1, %v338_v42  ;;  %828 = vmatprep.mubr.msk.f32.mxu1 %vm351_vm1, %v344_v51  ;;  %v347_v63 = vmax.f32 %v331_v58, 0.0  ;;  %v333_v0 = vadd.f32 %v922_v2, %v310_v59 }
  0x1e   : > { %v348_v3 = vmax.f32 %v332_v61, 0.0 }
  0x1f   : > { %v349_v1 = vmax.f32 %v333_v0, 0.0 }
  0x20   : > { %820 = vmatmul.mubr.msk.f32.gmra.mrb[4].mxu0 %vm351_vm1, %v339_v54  ;;  %829 = vmatmul.mubr.msk.f32.gmra.mrb[2].mxu1 %vm351_vm1, %v345_v57 }
  0x21   : > { %822 = vmatprep.mubr.msk.f32.mxu0 %vm351_vm1, %v340_v56  ;;  %831 = vmatprep.mubr.msk.f32.mxu1 %vm351_vm1, %v346_v60 }
  0x24   : > { %823 = vmatmul.mubr.msk.f32.gmra.mrb[6].mxu0 %vm351_vm1, %v341_v62  ;;  %832 = vmatmul.mubr.msk.f32.gmra.mrb[4].mxu1 %vm351_vm1, %v347_v63 }
  0x25   : > { %834 = vmatprep.mubr.msk.f32.mxu1 %vm351_vm1, %v348_v3 }
  0x28   : > { %835 = vmatmul.mubr.msk.f32.gmra.mrb[6].mxu1 %vm351_vm1, %v349_v1 }
  0xeb   : > { %v815_v2 = vpop.f32.mrb[0].mxu0 }
  0xec   : > { %550 = vst.msk [vmem:[%s993_s12 + $0x8] sm:$0xff] %vm351_vm1, %v815_v2  ;;  %v566_v4 = vsel %vm351_vm1, %v815_v2, 0.0  ;;  %v605_v5 = vmul.f32 %v815_v2, %v815_v2  ;;  %v470_v6 = vpop.f32.mrb[1].mxu0 }
  0xed   : > { %549 = vst.msk [vmem:[%s993_s12] sm:$0xff] %vm351_vm1, %v470_v6  ;;  %v565_v7 = vsel %vm351_vm1, %v470_v6, 0.0  ;;  %v604_v8 = vmul.f32 %v470_v6, %v470_v6 }
  0xee   : > { %v621_v9 = vsel %vm351_vm1, %v605_v5, 0.0  ;;  %v567_v10 = vadd.f32 %v566_v4, %v565_v7 }
  0xef   : > { %v620_v11 = vsel %vm351_vm1, %v604_v8, 0.0  ;;  %v818_v12 = vpop.f32.mrb[2].mxu0  ;;  %v827_v18 = vpop.f32.mrb[0].mxu1 }
  0xf0   : > { %v622_v13 = vadd.f32 %v621_v9, %v620_v11  ;;  %552 = vst.msk [vmem:[%s993_s12 + $0x18] sm:$0xff] %vm351_vm1, %v818_v12  ;;  %v480_v14 = vpop.f32.mrb[3].mxu0  ;;  %v607_v15 = vmul.f32 %v818_v12, %v818_v12  ;;  %558 = vst.msk [vmem:[%s993_s12 + $0x48] sm:$0xff] %vm351_vm1, %v827_v18  ;;  %v510_v20 = vpop.f32.mrb[1].mxu1  ;;  %v570_v21 = vsel %vm351_vm1, %v818_v12, 0.0  ;;  %v613_v56 = vmul.f32 %v827_v18, %v827_v18 }
  0xf1   : > { %551 = vst.msk [vmem:[%s993_s12 + $0x10] sm:$0xff] %vm351_vm1, %v480_v14  ;;  %v568_v16 = vsel %vm351_vm1, %v480_v14, 0.0  ;;  %v606_v17 = vmul.f32 %v480_v14, %v480_v14  ;;  %557 = vst.msk [vmem:[%s993_s12 + $0x40] sm:$0xff] %vm351_vm1, %v510_v20  ;;  %v612_v41 = vmul.f32 %v510_v20, %v510_v20  ;;  %v580_v52 = vsel %vm351_vm1, %v510_v20, 0.0 }
  0xf2   : > { %v569_v19 = vadd.f32 %v568_v16, %v567_v10  ;;  %v625_v27 = vsel %vm351_vm1, %v607_v15, 0.0  ;;  %v582_v63 = vsel %vm351_vm1, %v827_v18, 0.0  ;;  %v637_v2 = vsel %vm351_vm1, %v613_v56, 0.0 }
  0xf3   : > { %v623_v22 = vsel %vm351_vm1, %v606_v17, 0.0  ;;  %v821_v23 = vpop.f32.mrb[4].mxu0  ;;  %v830_v31 = vpop.f32.mrb[2].mxu1  ;;  %v635_v57 = vsel %vm351_vm1, %v612_v41, 0.0 }
  0xf4   : > { %v624_v24 = vadd.f32 %v623_v22, %v622_v13  ;;  %554 = vst.msk [vmem:[%s993_s12 + $0x28] sm:$0xff] %vm351_vm1, %v821_v23  ;;  %v490_v25 = vpop.f32.mrb[5].mxu0  ;;  %v571_v26 = vadd.f32 %v570_v21, %v569_v19  ;;  %v609_v28 = vmul.f32 %v821_v23, %v821_v23  ;;  %560 = vst.msk [vmem:[%s993_s12 + $0x58] sm:$0xff] %vm351_vm1, %v830_v31  ;;  %v520_v34 = vpop.f32.mrb[3].mxu1  ;;  %v574_v35 = vsel %vm351_vm1, %v821_v23, 0.0 }
  0xf5   : > { %553 = vst.msk [vmem:[%s993_s12 + $0x20] sm:$0xff] %vm351_vm1, %v490_v25  ;;  %v572_v29 = vsel %vm351_vm1, %v490_v25, 0.0  ;;  %v608_v30 = vmul.f32 %v490_v25, %v490_v25  ;;  %559 = vst.msk [vmem:[%s993_s12 + $0x50] sm:$0xff] %vm351_vm1, %v520_v34  ;;  %v614_v58 = vmul.f32 %v520_v34, %v520_v34  ;;  %v584_v0 = vsel %vm351_vm1, %v520_v34, 0.0 }
  0xf6   : > { %v573_v32 = vadd.f32 %v572_v29, %v571_v26  ;;  %v626_v33 = vadd.f32 %v625_v27, %v624_v24  ;;  %v629_v42 = vsel %vm351_vm1, %v609_v28, 0.0  ;;  %v615_v4 = vmul.f32 %v830_v31, %v830_v31 }
  0xf7   : > { %v627_v36 = vsel %vm351_vm1, %v608_v30, 0.0  ;;  %v824_v37 = vpop.f32.mrb[6].mxu0  ;;  %v833_v46 = vpop.f32.mrb[4].mxu1  ;;  %v639_v5 = vsel %vm351_vm1, %v614_v58, 0.0  ;;  %v586_v9 = vsel %vm351_vm1, %v830_v31, 0.0 }
  0xf8   : > { %v628_v38 = vadd.f32 %v627_v36, %v626_v33  ;;  %556 = vst.msk [vmem:[%s993_s12 + $0x38] sm:$0xff] %vm351_vm1, %v824_v37  ;;  %v500_v39 = vpop.f32.mrb[7].mxu0  ;;  %v575_v40 = vadd.f32 %v574_v35, %v573_v32  ;;  %v611_v43 = vmul.f32 %v824_v37, %v824_v37  ;;  %562 = vst.msk [vmem:[%s993_s12 + $0x68] sm:$0xff] %vm351_vm1, %v833_v46  ;;  %v530_v49 = vpop.f32.mrb[5].mxu1  ;;  %v578_v50 = vsel %vm351_vm1, %v824_v37, 0.0 }
  0xf9   : > { %555 = vst.msk [vmem:[%s993_s12 + $0x30] sm:$0xff] %vm351_vm1, %v500_v39  ;;  %v576_v44 = vsel %vm351_vm1, %v500_v39, 0.0  ;;  %v610_v45 = vmul.f32 %v500_v39, %v500_v39  ;;  %561 = vst.msk [vmem:[%s993_s12 + $0x60] sm:$0xff] %vm351_vm1, %v530_v49  ;;  %v616_v6 = vmul.f32 %v530_v49, %v530_v49  ;;  %v588_v10 = vsel %vm351_vm1, %v530_v49, 0.0 }
  0xfa   : > { %v577_v47 = vadd.f32 %v576_v44, %v575_v40  ;;  %v630_v48 = vadd.f32 %v629_v42, %v628_v38  ;;  %v633_v55 = vsel %vm351_vm1, %v611_v43, 0.0  ;;  %v641_v13 = vsel %vm351_vm1, %v615_v4, 0.0 }
  0xfb   : > { %v631_v51 = vsel %vm351_vm1, %v610_v45, 0.0  ;;  %v836_v59 = vpop.f32.mrb[6].mxu1  ;;  %v617_v14 = vmul.f32 %v833_v46, %v833_v46  ;;  %v643_v15 = vsel %vm351_vm1, %v616_v6, 0.0  ;;  %v590_v19 = vsel %vm351_vm1, %v833_v46, 0.0 }
  0xfc   : > { %v579_v53 = vadd.f32 %v578_v50, %v577_v47  ;;  %v632_v54 = vadd.f32 %v631_v51, %v630_v48  ;;  %564 = vst.msk [vmem:[%s993_s12 + $0x78] sm:$0xff] %vm351_vm1, %v836_v59  ;;  %v540_v62 = vpop.f32.mrb[7].mxu1  ;;  %v619_v24 = vmul.f32 %v836_v59, %v836_v59  ;;  %v594_v28 = vsel %vm351_vm1, %v836_v59, 0.0 }
  0xfd   : > { %563 = vst.msk [vmem:[%s993_s12 + $0x70] sm:$0xff] %vm351_vm1, %v540_v62  ;;  %v618_v16 = vmul.f32 %v540_v62, %v540_v62  ;;  %v592_v20 = vsel %vm351_vm1, %v540_v62, 0.0  ;;  %v645_v23 = vsel %vm351_vm1, %v617_v14, 0.0 }
  0xfe   : > { %v634_v60 = vadd.f32 %v633_v55, %v632_v54  ;;  %v581_v61 = vadd.f32 %v580_v52, %v579_v53  ;;  %v649_v31 = vsel %vm351_vm1, %v619_v24, 0.0 }
  0xff   : > { %v647_v25 = vsel %vm351_vm1, %v618_v16, 0.0 }
 0x100   : > { %v636_v3 = vadd.f32 %v635_v57, %v634_v60  ;;  %v583_v1 = vadd.f32 %v582_v63, %v581_v61 }
 0x102   : > { %v585_v7 = vadd.f32 %v584_v0, %v583_v1  ;;  %v638_v8 = vadd.f32 %v637_v2, %v636_v3 }
 0x104   : > { %v640_v11 = vadd.f32 %v639_v5, %v638_v8  ;;  %v587_v12 = vadd.f32 %v586_v9, %v585_v7 }
 0x106   : > { %v589_v17 = vadd.f32 %v588_v10, %v587_v12  ;;  %v642_v18 = vadd.f32 %v641_v13, %v640_v11 }
 0x108   : > { %v644_v21 = vadd.f32 %v643_v15, %v642_v18  ;;  %v591_v22 = vadd.f32 %v590_v19, %v589_v17 }
 0x10a   : > { %v593_v26 = vadd.f32 %v592_v20, %v591_v22  ;;  %v646_v27 = vadd.f32 %v645_v23, %v644_v21 }
 0x10c   : > { %v595_v29 = vadd.f32 %v594_v28, %v593_v26  ;;  %v648_v30 = vadd.f32 %v647_v25, %v646_v27 }
 0x10e   : > { %v596_v32 = vrot.slane %v595_v29, 4  ;;  %v650_v33 = vadd.f32 %v649_v31, %v648_v30 }
 0x110   : > { %v597_v34 = vadd.f32 %v596_v32, %v595_v29  ;;  %v651_v35 = vrot.slane %v650_v33, 4 }
 0x112   : > { %v598_v36 = vrot.slane %v597_v34, 2  ;;  %v652_v37 = vadd.f32 %v651_v35, %v650_v33 }
 0x114   : > { %v599_v38 = vadd.f32 %v598_v36, %v597_v34  ;;  %v653_v39 = vrot.slane %v652_v37, 2 }
 0x116   : > { %v600_v40 = vrot.slane %v599_v38, 1  ;;  %v654_v41 = vadd.f32 %v653_v39, %v652_v37 }
 0x118   : > { %v601_v42 = vadd.f32 %v600_v40, %v599_v38  ;;  %v655_v43 = vrot.slane %v654_v41, 1 }
 0x11a   : > { %603 = vst.msk [vmem:[%s268_s15] sm:$0x1] %vm602_vm2, %v601_v42  ;;  %v656_v44 = vadd.f32 %v655_v43, %v654_v41 }
 0x11c   : > { %657 = vst.msk [vmem:[%s271_s18] sm:$0x1] %vm602_vm2, %v656_v44 }
 0x11d PF: > { %s17_s21 = sadd.s32 1, %s853_s21  }
 0x11e   : > { %p14_p5 = scmp.ge.s32.totalorder %s17_s21, 6  }
 0x120   :  { %16 = sbr.rel (!%p14_p5) target bundleno = 1 (0x1), region = 90 }

// kernel: resblock_forward.3
= control target key start
LH: loop header
LB: loop body
LE: loop exit
PB: predicated region body
PF: predicated region fallthrough
CT: control target
= control target key end

     0   :  { %s3417_s21 = smov 0   ;;  %s3419_s22 = smov 0   ;;  %s4242_s0 = inlined_call_operand.vmem [shape: f32[2,16,18,4], index: 0, kind: input, shape index: {}, may-alias: {0,1,2}]   ;;  %s4243_s1 = inlined_call_operand.vmem [shape: f32[2,16,18,4], index: 1, kind: input, shape index: {}, may-alias: {0,1,2}]   ;;  %s4244_s2 = inlined_call_operand.vmem [shape: f32[2,16,18,4], index: 2, kind: input, shape index: {}, may-alias: {0,1,2}]   ;;  %s4245_s3 = inlined_call_operand.vmem [shape: f32[3,3,4,4], index: 3, kind: input, shape index: {}]   ;;  %s4246_s4 = inlined_call_operand.vmem [shape: f32[2,16,16,4], index: 4, kind: output, shape index: {0}]   ;;  %s4247_s5 = inlined_call_operand.vmem [shape: f32[2,2,1,4], index: 5, kind: output, shape index: {1}]   ;;  %s4248_s6 = inlined_call_operand.vmem [shape: f32[2,2,1,4], index: 6, kind: output, shape index: {2}]  }
   0x1   :  { %s3421_s23 = smov 0   ;;  %s3423_s24 = smov 0  }
   0x2   :  { %s3425_s25 = smov 0  }
   0x3 LB: > { %s26_s26 = sadd.s32 1, %s3372_s23  ;;  %s29_s27 = sadd.s32 1, %s3376_s24  ;;  %s3380_s25 = sphi %s3425_s25, %s17_s25   ;;  %s3376_s24 = sphi %s3423_s24, %s4267_s24   ;;  %s3372_s23 = sphi %s3421_s23, %s4266_s23   ;;  %s3368_s22 = sphi %s3419_s22, %s4265_s22   ;;  %s3364_s21 = sphi %s3417_s21, %s4264_s21  }
   0x4   : > { %p27_p0 = scmp.ge.s32.totalorder %s26_s26, 2  ;;  %p2588_p1 = scmp.ge.s32.totalorder %s3380_s25, 1 }
   0x5   : > { %p307_p2 = scmp.lt.s32.totalorder %s3380_s25, 5 }
   0x6   : > { %s4269_s26 = smov (%p27_p0, %s26_s26), 0  ;;  %s4271_s27 = smov (!%p27_p0, %s29_s27), %s3376_s24 }
   0x7   : > { %p308_p3 = pnand %p2588_p1, %p307_p2  ;;  %p31_p4 = scmp.ge.s32.totalorder %s4271_s27, 2 }
   0x8   : > { %v2610_v0 = vld [vmem:[%s4245_s3 + $0xc] sm:$0xf] (!%p308_p3)  ;;  %vm583_vm0 = vcmask (!%p308_p3), 1043456   ;;  %s3453_s30 = sshll.u32 (!%p308_p3), %s3364_s21, 3  ;;  %p388_p5 = scmp.lt.s32.totalorder (!%p308_p3), %s3368_s22, 1  ;;  %vm534_vm1 = vcmask (!%p308_p3), 31744  }
   0x9   : > { %s4273_s27 = smov (%p31_p4, %s4271_s27), 0  ;;  %311 = sbr.rel (%p308_p3) target bundleno = 406 (0x196), region = 36 }
   0xa   : > { %2934 = vmatprep.subr.msk.mxu1 (!%p308_p3), %vm583_vm0, %v2610_v0  ;;  %p390_p6 = scmp.lt.s32.totalorder (!%p308_p3), %s3453_s30, 15  ;;  %v3460_v1 = vld [vmem:[%s4245_s3 + $0x10] sm:$0xf] (!%p308_p3)  ;;  %v531_v2 = vld [vmem:[%s4245_s3] sm:$0xf] (!%p308_p3)  ;;  %s3484_s15 = sadd.s32 (!%p308_p3), 4294967295, %s3453_s30 }
   0xb   : > { %2935 = vmatpush3.msk.msra.mxu1 (!%p308_p3), %vm583_vm0, %v2610_v0  ;;  %3038 = vmatprep.subr.msk.mxu0 (!%p308_p3), %vm583_vm0, %v3460_v1  ;;  %v2699_v3 = vld [vmem:[%s4245_s3 + $0x1c] sm:$0xf] (!%p308_p3)  ;;  %p400_p7 = scmp.gt.s32.totalorder (!%p308_p3), %s3484_s15, 0  ;;  %p2593_p8 = scmp.lt.s32.totalorder (!%p308_p3), %s3484_s15, 15  ;;  %vm1066_vm2 = vcmask (!%p308_p3), 1046528   ;;  %vm1657_vm5 = vcmask (!%p308_p3), 1045504  }
   0xc   : > { %3039 = vmatpush3.msk.msra.mxu0 (!%p308_p3), %vm583_vm0, %v3460_v1  ;;  %2960 = vmatprep.subr.msk.mxu1 (!%p308_p3), %vm583_vm0, %v531_v2  ;;  %v3514_v12 = vld [vmem:[%s4245_s3 + $0x18] sm:$0xf] (!%p308_p3)  ;;  %v2717_v39 = vld [vmem:[%s4245_s3 + $0x8] sm:$0xf] (!%p308_p3)  ;;  %s2780_s11 = sadd.s32 (!%p308_p3), 8, %s3453_s30  ;;  %p505_p10 = scmp.gt.s32.totalorder (!%p308_p3), %s3364_s21, 0 }
   0xd   : > { %3064 = vmatprep.subr.msk.mxu0 (!%p308_p3), %vm583_vm0, %v2699_v3  ;;  %p3604_p9 = scmp.lt.s32.totalorder (!%p308_p3), %s2780_s11, 15  ;;  %p445_p11 = scmp.lt.s32.totalorder (!%p308_p3), %s3364_s21, 1  ;;  %vm2299_vm6 = vcmask (!%p308_p3), 24576  }
  0x10   : > { %s4275_s22 = smov (!%p388_p5, %s3368_s22), 1  ;;  %s4279_s11 = smov (!%p3604_p9, %s2780_s11), 15 }
  0x11   : > { %s3474_s13 = scalar_select %p390_p6, %s3453_s30, 15 }
  0x12   : > { %s3480_s14 = smul.u32 48, %s4275_s22  ;;  %s4281_s11 = smov (!%p3604_p9, %s4279_s11), 15 }
  0x13   : > { %s3298_s16 = smul.u32 3, %s3474_s13  ;;  %s2606_s19 = sshll.u32 %s4275_s22, 5 }
  0x14   : > { %s3499_s29 = scalar_select %p400_p7, %s3484_s15, 0 }
  0x15   : > { %s394_s17 = sadd.s32 %s3480_s14, %s3298_s16  ;;  %s4283_s21 = smov (!%p445_p11, %s3364_s21), 1 }
  0x16   : > { %s2590_s18 = sshll.u32 %s394_s17, 3  ;;  %s4277_s29 = smov (!%p2593_p8, %s3499_s29), 15 }
  0x17   : > { %s3492_s28 = scalar_lea.vmem %s4242_s0, %s2590_s18  ;;  %s3300_s30 = smul.u32 3, %s4277_s29 }
  0x18   : > { %v457_v4 = vld [vmem:[%s3492_s28] sm:$0xff]  ;;  %v458_v5 = vld [vmem:[%s3492_s28 + $0x8] sm:$0xff]  ;;  %v460_v6 = vld [vmem:[%s3492_s28 + $0x18] sm:$0xff]  ;;  %s3301_s17 = smul.u32 3, %s4281_s11 }
  0x19   : > { %v3501_v7 = vmax.f32 %v457_v4, 0.0  ;;  %v3503_v8 = vmax.f32 %v458_v5, 0.0  ;;  %v3505_v9 = vmax.f32 %v460_v6, 0.0  ;;  %v3508_v10 = vld [vmem:[%s3492_s28 + $0x10] sm:$0x3]  ;;  %v461_v11 = vld [vmem:[%s3492_s28 + $0x20] sm:$0xff]  ;;  %s408_s15 = sadd.s32 %s3300_s30, %s3480_s14 }
  0x1a   : > { %v483_v13 = vmax.f32 %v3508_v10, 0.0  ;;  %v3517_v14 = vmax.f32 %v461_v11, 0.0  ;;  %v463_v15 = vld [vmem:[%s3492_s28 + $0x30] sm:$0xff]  ;;  %v3521_v16 = vld [vmem:[%s3492_s28 + $0x28] sm:$0x3]  ;;  %v464_v17 = vld [vmem:[%s3492_s28 + $0x38] sm:$0xff]  ;;  %s425_s7 = sadd.s32 %s3301_s17, %s3480_s14 }
  0x1b   : > { %2936 = vmatprep.mubr.msk.f32.mxu1 %vm534_vm1, %v3501_v7  ;;  %v1072_v18 = vrot.slane %v3501_v7, 1  ;;  %v1073_v19 = vrot.slane %v3503_v8, 1  ;;  %v1077_v20 = vrot.slane %v3505_v9, 1  ;;  %v3529_v21 = vmax.f32 %v463_v15, 0.0  ;;  %v466_v22 = vld [vmem:[%s3492_s28 + $0x48] sm:$0xff]  ;;  %v467_v23 = vld [vmem:[%s3492_s28 + $0x50] sm:$0xff] }
  0x1c   : > { %2937 = vmatmul.mubr.msk.f32.vlgmr.msra.gmra.mrb[0].mxu1 %vm534_vm1, %v3503_v8  ;;  %v1075_v24 = vrot.slane %v483_v13, 1  ;;  %v1078_v25 = vrot.slane %v3517_v14, 1  ;;  %v486_v26 = vmax.f32 %v3521_v16, 0.0  ;;  %v3539_v27 = vmax.f32 %v464_v17, 0.0  ;;  %v3542_v28 = vld [vmem:[%s3492_s28 + $0x40] sm:$0x3] }
  0x1d   : > { %v3545_v29 = vsel %vm1066_vm2, %v1072_v18, %v1073_v19  ;;  %2939 = vmatprep.mubr.msk.f32.mxu1 %vm534_vm1, %v3505_v9  ;;  %2961 = vmatpush3.msk.msra.mxu1 %vm583_vm0, %v531_v2  ;;  %v1082_v30 = vrot.slane %v3529_v21, 1  ;;  %v3551_v31 = vmax.f32 %v466_v22, 0.0  ;;  %v489_v32 = vmax.f32 %v3542_v28, 0.0  ;;  %v3555_v33 = vld [vmem:[%s3492_s28 + $0x58] sm:$0x3]  ;;  %v469_v46 = vld [vmem:[%s3492_s28 + $0x60] sm:$0xff] }
  0x1e   : > { %3040 = vmatprep.mubr.msk.f32.mxu0 %vm534_vm1, %v3545_v29  ;;  %v3560_v34 = vsel %vm1066_vm2, %v1073_v19, %v1075_v24  ;;  %v3563_v35 = vsel %vm1066_vm2, %v1077_v20, %v1078_v25  ;;  %v1080_v36 = vrot.slane %v486_v26, 1  ;;  %v1083_v37 = vrot.slane %v3539_v27, 1  ;;  %2986 = vmatprep.subr.msk.mxu1 %vm583_vm0, %v3514_v12  ;;  %v470_v51 = vld [vmem:[%s3492_s28 + $0x68] sm:$0xff]  ;;  %v472_v52 = vld [vmem:[%s3492_s28 + $0x78] sm:$0xff]  ;;  %v473_v56 = vld [vmem:[%s3492_s28 + $0x80] sm:$0xff]  ;;  %s2598_s16 = sshll.u32 %s408_s15, 3 }
  0x1f   : > { %3041 = vmatmul.mubr.msk.f32.vlgmr.msra.gmra.mrb[0].mxu0 %vm534_vm1, %v3560_v34  ;;  %v3577_v38 = vmax.f32 %v467_v23, 0.0  ;;  %v1085_v41 = vrot.slane %v489_v32, 1  ;;  %v492_v42 = vmax.f32 %v3555_v33, 0.0  ;;  %v1087_v44 = vrot.slane %v3551_v31, 1  ;;  %v475_v57 = vld [vmem:[%s3492_s28 + $0x90] sm:$0xff]  ;;  %s3664_s29 = scalar_lea.vmem %s4243_s1, %s2598_s16  ;;  %v476_v61 = vld [vmem:[%s3492_s28 + $0x98] sm:$0xff] }
  0x20   : > { %3065 = vmatpush3.msk.msra.mxu0 %vm583_vm0, %v2699_v3  ;;  %2940 = vmatmul.mubr.msk.f32.gmra.mrb[2].mxu1 %vm534_vm1, %v3517_v14  ;;  %v3587_v40 = vsel %vm1066_vm2, %v1078_v25, %v1080_v36  ;;  %v3597_v43 = vsel %vm1066_vm2, %v1082_v30, %v1083_v37  ;;  %v3624_v50 = vmax.f32 %v469_v46, 0.0  ;;  %v3641_v54 = vmax.f32 %v470_v51, 0.0  ;;  %s3653_s18 = scalar_select %p505_p10, 1, 0  ;;  %v3667_v59 = vld [vmem:[%s3492_s28 + $0x70] sm:$0x3] }
  0x21   : > { %3043 = vmatprep.mubr.msk.f32.mxu0 %vm534_vm1, %v3563_v35  ;;  %2942 = vmatprep.mubr.msk.f32.mxu1 %vm534_vm1, %v3529_v21  ;;  %v1088_v45 = vrot.slane %v3577_v38, 1  ;;  %v3615_v47 = vsel %vm1066_vm2, %v1083_v37, %v1085_v41  ;;  %v1090_v48 = vrot.slane %v492_v42, 1  ;;  %v3647_v55 = vmax.f32 %v472_v52, 0.0  ;;  %v478_v62 = vld [vmem:[%s3492_s28 + $0xa8] sm:$0xff]  ;;  %s2603_s8 = sshll.u32 %s425_s7, 3  ;;  %v506_v63 = vld [vmem:[%s3664_s29] sm:$0xff] }
  0x22   : > { %3090 = vmatprep.subr.msk.mxu0 %vm583_vm0, %v2717_v39  ;;  %v3659_v58 = vmax.f32 %v473_v56, 0.0  ;;  %v3672_v60 = vmax.f32 %v475_v57, 0.0  ;;  %v4253_v0 = vmax.f32 %v3667_v59, 0.0  ;;  %v3684_v2 = vld [vmem:[%s4245_s3 + $0x14] sm:$0xf]  ;;  %v3689_v3 = vmax.f32 %v476_v61, 0.0  ;;  %s427_s30 = scalar_lea.vmem %s4244_s2, %s2603_s8 }
  0x23   : > { %3044 = vmatmul.mubr.msk.f32.gmra.mrb[2].mxu0 %vm534_vm1, %v3587_v40  ;;  %v3622_v49 = vsel %vm1066_vm2, %v1087_v44, %v1088_v45  ;;  %v3639_v53 = vsel %vm1066_vm2, %v1088_v45, %v1090_v48  ;;  %v3691_v4 = vmax.f32 %v478_v62, 0.0  ;;  %v479_v5 = vld [vmem:[%s3492_s28 + $0xb0] sm:$0xff]  ;;  %v513_v6 = vstv %s3653_s18  ;;  %v3705_v17 = vld [vmem:[%s3492_s28 + $0x88] sm:$0x3]  ;;  %s3709_s12 = scalar_select %p445_p11, 1, 0 }
  0x24   : > { %2943 = vmatmul.mubr.msk.f32.gmra.mrb[4].mxu1 %vm534_vm1, %v3539_v27  ;;  %3046 = vmatprep.mubr.msk.f32.mxu0 %vm534_vm1, %v3597_v43  ;;  %v1092_v11 = vrot.slane %v3624_v50, 1  ;;  %v1093_v15 = vrot.slane %v3641_v54, 1  ;;  %v507_v18 = vld [vmem:[%s3664_s29 + $0x8] sm:$0xff]  ;;  %v509_v19 = vmax.f32 %v506_v63, 0.0  ;;  %vm3716_vm3 = vcmp.eq.s32.totalorder %v513_v6, 1  ;;  %v519_v51 = vld [vmem:[%s427_s30] sm:$0xff] }
  0x25   : > { %2945 = vmatprep.mubr.msk.f32.mxu1 %vm534_vm1, %v3551_v31  ;;  %v1095_v22 = vrot.slane %v4253_v0, 1  ;;  %v3726_v23 = vmax.f32 %v479_v5, 0.0  ;;  %v1097_v24 = vrot.slane %v3647_v55, 1  ;;  %v4250_v25 = vmax.f32 %v3705_v17, 0.0  ;;  %v520_v30 = vld [vmem:[%s427_s30 + $0x8] sm:$0xff]  ;;  %s2605_s18 = sshll.u32 %s3474_s13, 1 }
  0x26   : > { %v3733_v36 = vsel %vm1066_vm2, %v1092_v11, %v1093_v15  ;;  %v510_v37 = vmax.f32 %v507_v18, 0.0  ;;  %v3737_v41 = vld [vmem:[%s3492_s28 + $0xa0] sm:$0x3]  ;;  %v526_v44 = vstv %s3709_s12  ;;  %v521_v45 = vld [vmem:[%s427_s30 + $0x10] sm:$0x3]  ;;  %v3742_v46 = vsel %vm3716_vm3, %v509_v19, 0.0  ;;  %s439_s20 = sadd.s32 %s2606_s19, %s2605_s18 }
  0x27   : > { %3047 = vmatmul.mubr.msk.f32.gmra.mrb[4].mxu0 %vm534_vm1, %v3615_v47  ;;  %v3747_v48 = vsel %vm1066_vm2, %v1093_v15, %v1095_v22  ;;  %v523_v52 = vmax.f32 %v520_v30, 0.0  ;;  %v1100_v56 = vrot.slane %v4250_v25, 1  ;;  %v4249_v57 = vmax.f32 %v3737_v41, 0.0  ;;  %v3757_v61 = vld [vmem:[%s3492_s28 + $0xb8] sm:$0x3]  ;;  %s2608_s13 = sshll.u32 %s4275_s22, 1 }
  0x28   : > { %2946 = vmatmul.mubr.msk.f32.gmra.mrb[6].mxu1 %vm534_vm1, %v3577_v38  ;;  %3049 = vmatprep.mubr.msk.f32.mxu0 %vm534_vm1, %v3622_v49  ;;  %vm3759_vm4 = vcmp.eq.s32.totalorder %v526_v44, 1  ;;  %v524_v63 = vmax.f32 %v521_v45, 0.0  ;;  %v3765_v5 = vsel %vm3716_vm3, %v510_v37, 0.0  ;;  %v1102_v11 = vrot.slane %v3672_v60, 1  ;;  %s448_s9 = sadd.s32 %s2608_s13, %s4283_s21 }
  0x29   : > { %2948 = vmatprep.mubr.msk.f32.mxu1 %vm534_vm1, %v3624_v50  ;;  %v1103_v15 = vrot.slane %v3689_v3, 1  ;;  %v522_v18 = vmax.f32 %v519_v51, 0.0  ;;  %v4252_v19 = vmax.f32 %v3757_v61, 0.0  ;;  %v3779_v22 = vsel %vm3759_vm4, %v523_v52, 0.0  ;;  %s449_s30 = scalar_lea.vmem %s4247_s5, %s448_s9  ;;  %s456_s15 = scalar_lea.vmem %s4248_s6, %s448_s9 }
  0x2a   : > { %v1105_v37 = vrot.slane %v4249_v57, 1  ;;  %v530_v44 = vsel %vm3759_vm4, %v524_v63, 0.0  ;;  %v4251_v45 = vrot.slane %v3779_v22, 2  ;;  %v1307_v52 = vrot.slane %v3726_v23, 1  ;;  %v508_v57 = vld [vmem:[%s3664_s29 + $0x10] sm:$0x3] }
  0x2b   : > { %3050 = vmatmul.mubr.msk.f32.gmra.mrb[6].mxu0 %vm534_vm1, %v3639_v53  ;;  %v3803_v51 = vsel %vm1066_vm2, %v1102_v11, %v1103_v15  ;;  %v3810_v63 = vsel %vm3759_vm4, %v522_v18, 0.0  ;;  %v1309_v11 = vrot.slane %v4252_v19, 1  ;;  %v511_v18 = vmax.f32 %v508_v57, 0.0  ;;  %s2607_s29 = sshll.u32 %s439_s20, 3 }
  0x2c   : > { %2949 = vmatmul.mubr.msk.f32.gmra.mrb[8].mxu1 %vm534_vm1, %v3641_v54  ;;  %3066 = vmatprep.mubr.msk.f32.mxu0 %vm534_vm1, %v3563_v35  ;;  %v3826_v62 = vsel %vm1066_vm2, %v1103_v15, %v1105_v37  ;;  %v1485_v15 = vrot.slane %v530_v44, 1  ;;  %v1659_v0 = vrot.slane %v3765_v5, 2  ;;  %s4151_s14 = scalar_lea.vmem %s4246_s4, %s2607_s29 }
  0x2d   : > { %2951 = vmatprep.mubr.msk.f32.mxu1 %vm534_vm1, %v3647_v55  ;;  %v3844_v57 = vsel %vm1066_vm2, %v1307_v52, %v1309_v11  ;;  %v3848_v37 = vsel %vm3716_vm3, %v511_v18, 0.0  ;;  %v1663_v11 = vrot.slane %v3501_v7, 2  ;;  %v1664_v18 = vrot.slane %v3503_v8, 2 }
  0x2f   : > { %3067 = vmatmul.mubr.msk.f32.vlgmr.msra.gmra.mrb[0].mxu0 %vm534_vm1, %v3587_v40 }
  0x30   : > { %3091 = vmatpush3.msk.msra.mxu0 %vm583_vm0, %v2717_v39  ;;  %2952 = vmatmul.mubr.msk.f32.gmra.mrb[10].mxu1 %vm534_vm1, %v3659_v58  ;;  %v1098_v39 = vrot.slane %v3659_v58, 1 }
  0x31   : > { %3069 = vmatprep.mubr.msk.f32.mxu0 %vm534_vm1, %v3597_v43  ;;  %2954 = vmatprep.mubr.msk.f32.mxu1 %vm534_vm1, %v3672_v60 }
  0x32   : > { %3116 = vmatprep.subr.msk.mxu0 %vm583_vm0, %v3684_v2  ;;  %v3770_v6 = vsel %vm1066_vm2, %v1097_v24, %v1098_v39  ;;  %v3784_v24 = vld [vmem:[%s4245_s3 + $0x4] sm:$0xf]  ;;  %v3791_v30 = vsel %vm1066_vm2, %v1098_v39, %v1100_v56  ;;  %v1306_v39 = vrot.slane %v3691_v4, 1  ;;  %v2074_v56 = vrot.slane %v530_v44, 2 }
  0x33   : > { %3070 = vmatmul.mubr.msk.f32.gmra.mrb[2].mxu0 %vm534_vm1, %v3615_v47 }
  0x34   : > { %2955 = vmatmul.mubr.msk.f32.gmra.mrb[12].mxu1 %vm534_vm1, %v3689_v3  ;;  %3072 = vmatprep.mubr.msk.f32.mxu0 %vm534_vm1, %v3622_v49  ;;  %v3833_v25 = vsel %vm1066_vm2, %v1306_v39, %v1307_v52  ;;  %v1658_v39 = vrot.slane %v3742_v46, 2  ;;  %v1661_v52 = vrot.slane %v3848_v37, 2 }
  0x35   : > { %2957 = vmatprep.mubr.msk.f32.mxu1 %vm534_vm1, %v3691_v4 }
  0x36   : > { %v1660_v44 = vsel %vm1657_vm5, %v1658_v39, %v1659_v0  ;;  %v1673_v39 = vrot.slane %v3529_v21, 2 }
  0x37   : > { %3073 = vmatmul.mubr.msk.f32.gmra.mrb[4].mxu0 %vm534_vm1, %v3639_v53 }
  0x38   : > { %2958 = vmatmul.mubr.msk.f32.gmra.mrb[14].mxu1 %vm534_vm1, %v3726_v23  ;;  %3075 = vmatprep.mubr.msk.f32.mxu0 %vm534_vm1, %v3733_v36 }
  0x39   : > { %2962 = vmatprep.mubr.msk.f32.mxu1 %vm534_vm1, %v3742_v46 }
  0x3b   : > { %3076 = vmatmul.mubr.msk.f32.gmra.mrb[6].mxu0 %vm534_vm1, %v3747_v48 }
  0x3c   : > { %2963 = vmatmul.mubr.msk.f32.vlgmr.msra.gmra.mrb[0].mxu1 %vm534_vm1, %v3765_v5  ;;  %3078 = vmatprep.mubr.msk.f32.mxu0 %vm534_vm1, %v3770_v6 }
  0x3d   : > { %2965 = vmatprep.mubr.msk.f32.mxu1 %vm534_vm1, %v3501_v7  ;;  %2987 = vmatpush3.msk.msra.mxu1 %vm583_vm0, %v3514_v12  ;;  %v3819_v12 = vsel %vm1657_vm5, %v4251_v45, %v2074_v56  ;;  %v1482_v56 = vrot.slane %v3810_v63, 1  ;;  %v1483_v45 = vrot.slane %v3779_v22, 1  ;;  %v1669_v7 = vrot.slane %v3517_v14, 2 }
  0x3e   : > { %3012 = vmatprep.subr.msk.mxu1 %vm583_vm0, %v3784_v24 }
  0x3f   : > { %3079 = vmatmul.mubr.msk.f32.gmra.mrb[8].mxu0 %vm534_vm1, %v3791_v30  ;;  %v1484_v19 = vsel %vm1066_vm2, %v1482_v56, %v1483_v45  ;;  %v1486_v20 = vsel %vm1066_vm2, %v1483_v45, %v1485_v15  ;;  %v1666_v45 = vrot.slane %v483_v13, 2  ;;  %v1668_v56 = vrot.slane %v3505_v9, 2  ;;  %v3885_v15 = vld [vmem:[%s4245_s3 + $0x20] sm:$0xf] }
  0x40   : > { %2966 = vmatmul.mubr.msk.f32.gmra.mrb[2].mxu1 %vm534_vm1, %v3503_v8  ;;  %3081 = vmatprep.mubr.msk.f32.mxu0 %vm534_vm1, %v3803_v51  ;;  %v3879_v8 = vsel %vm1657_vm5, %v1663_v11, %v1664_v18  ;;  %v1671_v13 = vrot.slane %v486_v26, 2  ;;  %v1676_v26 = vrot.slane %v489_v32, 2  ;;  %v1681_v32 = vrot.slane %v492_v42, 2 }
  0x41   : > { %2968 = vmatprep.mubr.msk.f32.mxu1 %vm534_vm1, %v3505_v9  ;;  %v1667_v10 = vsel %vm1657_vm5, %v1664_v18, %v1666_v45  ;;  %v1683_v18 = vrot.slane %v3624_v50, 2 }
  0x42   : > { %v3911_v16 = vsel %vm1657_vm5, %v1669_v7, %v1671_v13  ;;  %v1693_v13 = vrot.slane %v3672_v60, 2 }
  0x43   : > { %3082 = vmatmul.mubr.msk.f32.gmra.mrb[10].mxu0 %vm534_vm1, %v3826_v62 }
  0x44   : > { %2969 = vmatmul.mubr.msk.f32.gmra.mrb[4].mxu1 %vm534_vm1, %v3517_v14  ;;  %3084 = vmatprep.mubr.msk.f32.mxu0 %vm534_vm1, %v3833_v25 }
  0x45   : > { %2971 = vmatprep.mubr.msk.f32.mxu1 %vm534_vm1, %v3529_v21 }
  0x47   : > { %3085 = vmatmul.mubr.msk.f32.gmra.mrb[12].mxu0 %vm534_vm1, %v3844_v57 }
  0x48   : > { %2972 = vmatmul.mubr.msk.f32.gmra.mrb[6].mxu1 %vm534_vm1, %v3539_v27  ;;  %3087 = vmatprep.mubr.msk.f32.mxu0 %vm534_vm1, %v1484_v19  ;;  %v1662_v19 = vsel %vm1657_vm5, %v1659_v0, %v1661_v52  ;;  %v3899_v0 = vsel %vm1657_vm5, %v1668_v56, %v1669_v7  ;;  %v1689_v56 = vrot.slane %v3659_v58, 2 }
  0x49   : > { %2974 = vmatprep.mubr.msk.f32.mxu1 %vm534_vm1, %v3551_v31 }
  0x4b   : > { %3088 = vmatmul.mubr.msk.f32.gmra.mrb[14].mxu0 %vm534_vm1, %v1486_v20  ;;  %v1678_v20 = vrot.slane %v3551_v31, 2 }
  0x4c   : > { %2975 = vmatmul.mubr.msk.f32.gmra.mrb[8].mxu1 %vm534_vm1, %v3577_v38  ;;  %3092 = vmatprep.mubr.msk.f32.mxu0 %vm534_vm1, %v1660_v44  ;;  %v1679_v44 = vrot.slane %v3577_v38, 2 }
  0x4d   : > { %2977 = vmatprep.mubr.msk.f32.mxu1 %vm534_vm1, %v3624_v50 }
  0x4e   : > { %v3936_v11 = vsel %vm1657_vm5, %v1678_v20, %v1679_v44  ;;  %v3947_v33 = vsel %vm1657_vm5, %v1679_v44, %v1681_v32 }
  0x4f   : > { %3093 = vmatmul.mubr.msk.f32.vlgmr.msra.gmra.mrb[0].mxu0 %vm534_vm1, %v1662_v19  ;;  %v1684_v19 = vrot.slane %v3641_v54, 2 }
  0x50   : > { %3117 = vmatpush3.msk.msra.mxu0 %vm583_vm0, %v3684_v2  ;;  %2978 = vmatmul.mubr.msk.f32.gmra.mrb[10].mxu1 %vm534_vm1, %v3641_v54  ;;  %v1674_v2 = vrot.slane %v3539_v27, 2 }
  0x51   : > { %3095 = vmatprep.mubr.msk.f32.mxu0 %vm534_vm1, %v3879_v8  ;;  %2980 = vmatprep.mubr.msk.f32.mxu1 %vm534_vm1, %v3647_v55  ;;  %v3956_v45 = vsel %vm1657_vm5, %v1683_v18, %v1684_v19 }
  0x52   : > { %3142 = vmatprep.subr.msk.mxu0 %vm583_vm0, %v3885_v15  ;;  %v3918_v52 = vsel %vm1657_vm5, %v1673_v39, %v1674_v2  ;;  %v3929_v28 = vsel %vm1657_vm5, %v1674_v2, %v1676_v26  ;;  %v1694_v39 = vrot.slane %v3689_v3, 2 }
  0x53   : > { %3096 = vmatmul.mubr.msk.f32.gmra.mrb[2].mxu0 %vm534_vm1, %v1667_v10 }
  0x54   : > { %2981 = vmatmul.mubr.msk.f32.gmra.mrb[12].mxu1 %vm534_vm1, %v3659_v58  ;;  %3098 = vmatprep.mubr.msk.f32.mxu0 %vm534_vm1, %v3899_v0  ;;  %v3994_v2 = vsel %vm1657_vm5, %v1693_v13, %v1694_v39 }
  0x55   : > { %2983 = vmatprep.mubr.msk.f32.mxu1 %vm534_vm1, %v3672_v60 }
  0x57   : > { %3099 = vmatmul.mubr.msk.f32.gmra.mrb[4].mxu0 %vm534_vm1, %v3911_v16 }
  0x58   : > { %2984 = vmatmul.mubr.msk.f32.gmra.mrb[14].mxu1 %vm534_vm1, %v3689_v3  ;;  %3101 = vmatprep.mubr.msk.f32.mxu0 %vm534_vm1, %v3918_v52 }
  0x59   : > { %2988 = vmatprep.mubr.msk.f32.mxu1 %vm534_vm1, %v3505_v9  ;;  %v4259_v9 = vmax.f32 %v3667_v59, 0.0  ;;  %v4260_v59 = vmax.f32 %v3705_v17, 0.0 }
  0x5b   : > { %3102 = vmatmul.mubr.msk.f32.gmra.mrb[6].mxu0 %vm534_vm1, %v3929_v28  ;;  %v1686_v42 = vrot.slane %v4259_v9, 2 }
  0x5c   : > { %2989 = vmatmul.mubr.msk.f32.vlgmr.msra.gmra.mrb[0].mxu1 %vm534_vm1, %v3517_v14  ;;  %3104 = vmatprep.mubr.msk.f32.mxu0 %vm534_vm1, %v3936_v11  ;;  %v1688_v14 = vrot.slane %v3647_v55, 2 }
  0x5d   : > { %2991 = vmatprep.mubr.msk.f32.mxu1 %vm534_vm1, %v3529_v21  ;;  %3013 = vmatpush3.msk.msra.mxu1 %vm583_vm0, %v3784_v24  ;;  %v3969_v21 = vsel %vm1657_vm5, %v1684_v19, %v1686_v42  ;;  %v1691_v24 = vrot.slane %v4260_v59, 2 }
  0x5e   : > { %3168 = vmatprep.subr.msk.mxu1 %vm583_vm0, %v3460_v1  ;;  %v3976_v7 = vsel %vm1657_vm5, %v1688_v14, %v1689_v56 }
  0x5f   : > { %3105 = vmatmul.mubr.msk.f32.gmra.mrb[8].mxu0 %vm534_vm1, %v3947_v33 }
  0x60   : > { %2992 = vmatmul.mubr.msk.f32.gmra.mrb[2].mxu1 %vm534_vm1, %v3539_v27  ;;  %3107 = vmatprep.mubr.msk.f32.mxu0 %vm534_vm1, %v3956_v45  ;;  %v3987_v27 = vsel %vm1657_vm5, %v1689_v56, %v1691_v24 }
  0x61   : > { %2994 = vmatprep.mubr.msk.f32.mxu1 %vm534_vm1, %v3551_v31  ;;  %v4261_v31 = vmax.f32 %v3737_v41, 0.0  ;;  %v1897_v41 = vrot.slane %v3726_v23, 2 }
  0x63   : > { %3108 = vmatmul.mubr.msk.f32.gmra.mrb[10].mxu0 %vm534_vm1, %v3969_v21  ;;  %v1696_v17 = vrot.slane %v4261_v31, 2 }
  0x64   : > { %2995 = vmatmul.mubr.msk.f32.gmra.mrb[4].mxu1 %vm534_vm1, %v3577_v38  ;;  %3110 = vmatprep.mubr.msk.f32.mxu0 %vm534_vm1, %v3976_v7 }
  0x65   : > { %2997 = vmatprep.mubr.msk.f32.mxu1 %vm534_vm1, %v3624_v50  ;;  %v4003_v38 = vsel %vm1657_vm5, %v1694_v39, %v1696_v17  ;;  %v1067_v50 = vrot.slane %v3742_v46, 1 }
  0x67   : > { %3111 = vmatmul.mubr.msk.f32.gmra.mrb[12].mxu0 %vm534_vm1, %v3987_v27 }
  0x68   : > { %2998 = vmatmul.mubr.msk.f32.gmra.mrb[6].mxu1 %vm534_vm1, %v3641_v54  ;;  %3113 = vmatprep.mubr.msk.f32.mxu0 %vm534_vm1, %v3994_v2  ;;  %v1068_v54 = vrot.slane %v3765_v5, 1 }
  0x69   : > { %3000 = vmatprep.mubr.msk.f32.mxu1 %vm534_vm1, %v3647_v55  ;;  %v1070_v55 = vrot.slane %v3848_v37, 1 }
  0x6b   : > { %3114 = vmatmul.mubr.msk.f32.gmra.mrb[14].mxu0 %vm534_vm1, %v4003_v38 }
  0x6c   : > { %3001 = vmatmul.mubr.msk.f32.gmra.mrb[8].mxu1 %vm534_vm1, %v3659_v58  ;;  %3118 = vmatprep.mubr.msk.f32.mxu0 %vm534_vm1, %v3879_v8  ;;  %v1069_v58 = vsel %vm1066_vm2, %v1067_v50, %v1068_v54 }
  0x6d   : > { %3003 = vmatprep.mubr.msk.f32.mxu1 %vm534_vm1, %v3672_v60  ;;  %v1071_v60 = vsel %vm1066_vm2, %v1068_v54, %v1070_v55 }
  0x6f   : > { %3119 = vmatmul.mubr.msk.f32.vlgmr.msra.gmra.mrb[0].mxu0 %vm534_vm1, %v1667_v10 }
  0x70   : > { %3143 = vmatpush3.msk.msra.mxu0 %vm583_vm0, %v3885_v15  ;;  %3004 = vmatmul.mubr.msk.f32.gmra.mrb[10].mxu1 %vm534_vm1, %v3689_v3  ;;  %v1896_v3 = vrot.slane %v3691_v4, 2 }
  0x71   : > { %3121 = vmatprep.mubr.msk.f32.mxu0 %vm534_vm1, %v3899_v0  ;;  %3006 = vmatprep.mubr.msk.f32.mxu1 %vm534_vm1, %v3691_v4 }
  0x73   : > { %3122 = vmatmul.mubr.msk.f32.gmra.mrb[2].mxu0 %vm534_vm1, %v3911_v16 }
  0x74   : > { %3007 = vmatmul.mubr.msk.f32.gmra.mrb[12].mxu1 %vm534_vm1, %v3726_v23  ;;  %3124 = vmatprep.mubr.msk.f32.mxu0 %vm534_vm1, %v3918_v52 }
  0x75   : > { %3009 = vmatprep.mubr.msk.f32.mxu1 %vm534_vm1, %v3810_v63 }
  0x77   : > { %3125 = vmatmul.mubr.msk.f32.gmra.mrb[4].mxu0 %vm534_vm1, %v3929_v28 }
  0x78   : > { %3010 = vmatmul.mubr.msk.f32.gmra.mrb[14].mxu1 %vm534_vm1, %v3779_v22  ;;  %3127 = vmatprep.mubr.msk.f32.mxu0 %vm534_vm1, %v3936_v11 }
  0x79   : > { %3014 = vmatprep.mubr.msk.f32.mxu1 %vm534_vm1, %v1069_v58 }
  0x7b   : > { %3128 = vmatmul.mubr.msk.f32.gmra.mrb[6].mxu0 %vm534_vm1, %v3947_v33 }
  0x7c   : > { %3015 = vmatmul.mubr.msk.f32.vlgmr.msra.gmra.mrb[0].mxu1 %vm534_vm1, %v1071_v60  ;;  %3130 = vmatprep.mubr.msk.f32.mxu0 %vm534_vm1, %v3956_v45 }
  0x7d   : > { %3017 = vmatprep.mubr.msk.f32.mxu1 %vm534_vm1, %v3545_v29  ;;  %3169 = vmatpush3.msk.msra.mxu1 %vm583_vm0, %v3460_v1  ;;  %v4262_v1 = vmax.f32 %v3757_v61, 0.0 }
  0x7f   : > { %3131 = vmatmul.mubr.msk.f32.gmra.mrb[8].mxu0 %vm534_vm1, %v3969_v21  ;;  %v1899_v29 = vrot.slane %v4262_v1, 2 }
  0x80   : > { %3018 = vmatmul.mubr.msk.f32.gmra.mrb[2].mxu1 %vm534_vm1, %v3560_v34  ;;  %3133 = vmatprep.mubr.msk.f32.mxu0 %vm534_vm1, %v3976_v7  ;;  %v1898_v34 = vsel %vm1657_vm5, %v1896_v3, %v1897_v41 }
  0x81   : > { %3020 = vmatprep.mubr.msk.f32.mxu1 %vm534_vm1, %v3563_v35  ;;  %v1900_v35 = vsel %vm1657_vm5, %v1897_v41, %v1899_v29 }
  0x83   : > { %3134 = vmatmul.mubr.msk.f32.gmra.mrb[10].mxu0 %vm534_vm1, %v3987_v27 }
  0x84   : > { %3021 = vmatmul.mubr.msk.f32.gmra.mrb[4].mxu1 %vm534_vm1, %v3587_v40  ;;  %3136 = vmatprep.mubr.msk.f32.mxu0 %vm534_vm1, %v3994_v2  ;;  %v2071_v40 = vrot.slane %v3810_v63, 2 }
  0x85   : > { %3023 = vmatprep.mubr.msk.f32.mxu1 %vm534_vm1, %v3597_v43  ;;  %v4263_v43 = vrot.slane %v3779_v22, 2 }
  0x87   : > { %3137 = vmatmul.mubr.msk.f32.gmra.mrb[12].mxu0 %vm534_vm1, %v4003_v38 }
  0x88   : > { %3024 = vmatmul.mubr.msk.f32.gmra.mrb[6].mxu1 %vm534_vm1, %v3615_v47  ;;  %3139 = vmatprep.mubr.msk.f32.mxu0 %vm534_vm1, %v1898_v34  ;;  %v2073_v47 = vsel %vm1657_vm5, %v2071_v40, %v4263_v43 }
  0x89   : > { %3026 = vmatprep.mubr.msk.f32.mxu1 %vm534_vm1, %v3622_v49 }
  0x8b   : > { %3140 = vmatmul.mubr.msk.f32.gmra.mrb[14].mxu0 %vm534_vm1, %v1900_v35 }
  0x8c   : > { %3027 = vmatmul.mubr.msk.f32.gmra.mrb[8].mxu1 %vm534_vm1, %v3639_v53  ;;  %3144 = vmatprep.mubr.msk.f32.mxu0 %vm534_vm1, %v3899_v0 }
  0x8d   : > { %3029 = vmatprep.mubr.msk.f32.mxu1 %vm534_vm1, %v3733_v36 }
  0x8f   : > { %3145 = vmatmul.mubr.msk.f32.vlgmr.msra.gmra.mrb[0].mxu0 %vm534_vm1, %v3911_v16 }
  0x90   : > { %3030 = vmatmul.mubr.msk.f32.gmra.mrb[10].mxu1 %vm534_vm1, %v3747_v48  ;;  %3147 = vmatprep.mubr.msk.f32.mxu0 %vm534_vm1, %v3918_v52 }
  0x91   : > { %3032 = vmatprep.mubr.msk.f32.mxu1 %vm534_vm1, %v3770_v6 }
  0x93   : > { %3148 = vmatmul.mubr.msk.f32.gmra.mrb[2].mxu0 %vm534_vm1, %v3929_v28 }
  0x94   : > { %3033 = vmatmul.mubr.msk.f32.gmra.mrb[12].mxu1 %vm534_vm1, %v3791_v30  ;;  %3150 = vmatprep.mubr.msk.f32.mxu0 %vm534_vm1, %v3936_v11 }
  0x95   : > { %3035 = vmatprep.mubr.msk.f32.mxu1 %vm534_vm1, %v3803_v51 }
  0x97   : > { %3151 = vmatmul.mubr.msk.f32.gmra.mrb[4].mxu0 %vm534_vm1, %v3947_v33 }
  0x98   : > { %3036 = vmatmul.mubr.msk.f32.gmra.mrb[14].mxu1 %vm534_vm1, %v3826_v62  ;;  %3153 = vmatprep.mubr.msk.f32.mxu0 %vm534_vm1, %v3956_v45 }
  0x99   : > { %3052 = vmatprep.mubr.msk.f32.mxu1 %vm534_vm1, %v3733_v36 }
  0x9b   : > { %3154 = vmatmul.mubr.msk.f32.gmra.mrb[6].mxu0 %vm534_vm1, %v3969_v21 }
  0x9c   : > { %3053 = vmatmul.mubr.msk.f32.vlgmr.msra.gmra.mrb[8].mxu1 %vm534_vm1, %v3747_v48  ;;  %3156 = vmatprep.mubr.msk.f32.mxu0 %vm534_vm1, %v3976_v7 }
  0x9d   : > { %3055 = vmatprep.mubr.msk.f32.mxu1 %vm534_vm1, %v3770_v6 }
  0x9f   : > { %3157 = vmatmul.mubr.msk.f32.gmra.mrb[8].mxu0 %vm534_vm1, %v3987_v27 }
  0xa0   : > { %3056 = vmatmul.mubr.msk.f32.gmra.mrb[10].mxu1 %vm534_vm1, %v3791_v30  ;;  %3159 = vmatprep.mubr.msk.f32.mxu0 %vm534_vm1, %v3994_v2 }
  0xa1   : > { %3058 = vmatprep.mubr.msk.f32.mxu1 %vm534_vm1, %v3803_v51 }
  0xa3   : > { %3160 = vmatmul.mubr.msk.f32.gmra.mrb[10].mxu0 %vm534_vm1, %v4003_v38 }
  0xa4   : > { %3059 = vmatmul.mubr.msk.f32.gmra.mrb[12].mxu1 %vm534_vm1, %v3826_v62  ;;  %3162 = vmatprep.mubr.msk.f32.mxu0 %vm534_vm1, %v1898_v34 }
  0xa5   : > { %3061 = vmatprep.mubr.msk.f32.mxu1 %vm534_vm1, %v3833_v25 }
  0xa7   : > { %3163 = vmatmul.mubr.msk.f32.gmra.mrb[12].mxu0 %vm534_vm1, %v1900_v35 }
  0xa8   : > { %3062 = vmatmul.mubr.msk.f32.gmra.mrb[14].mxu1 %vm534_vm1, %v3844_v57  ;;  %3165 = vmatprep.mubr.msk.f32.mxu0 %vm534_vm1, %v2073_v47 }
  0xab   : > { %3166 = vmatmul.mubr.msk.f32.gmra.mrb[14].mxu0 %vm534_vm1, %v3819_v12 }
 0x14f   : > { %v3016_v49 = vpop.f32.mrb[0].mxu1 }
 0x150   : > { %v1210_v53 = vpop.f32.mrb[1].mxu1 }
 0x153   : > { %v3019_v4 = vpop.f32.mrb[2].mxu1 }
 0x154   : > { %v1220_v23 = vpop.f32.mrb[3].mxu1 }
 0x157   : > { %v3022_v36 = vpop.f32.mrb[4].mxu1 }
 0x158   : > { %v1230_v25 = vpop.f32.mrb[5].mxu1 }
 0x15b   : > { %v3025_v46 = vpop.f32.mrb[6].mxu1 }
 0x15c   : > { %v1240_v48 = vpop.f32.mrb[7].mxu1 }
 0x162   : > { %v3146_v61 = vpop.f32.mrb[0].mxu0 }
 0x163   : > { %v3170_v5 = vadd.f32 %v3146_v61, %v3016_v49  ;;  %v2151_v6 = vpop.f32.mrb[1].mxu0 }
 0x164   : > { %v3171_v22 = vadd.f32 %v2151_v6, %v1210_v53 }
 0x165   : > { %2247 = vst.msk [vmem:[%s4151_s14 + $0x8] sm:$0xff] %vm534_vm1, %v3170_v5  ;;  %v2263_v30 = vsel %vm534_vm1, %v3170_v5, 0.0  ;;  %v2302_v51 = vmul.f32 %v3170_v5, %v3170_v5 }
 0x166   : > { %2246 = vst.msk [vmem:[%s4151_s14] sm:$0xff] %vm534_vm1, %v3171_v22  ;;  %v2262_v63 = vsel %vm534_vm1, %v3171_v22, 0.0  ;;  %v2301_v12 = vmul.f32 %v3171_v22, %v3171_v22  ;;  %v3149_v62 = vpop.f32.mrb[2].mxu0 }
 0x167   : > { %v2318_v57 = vsel %vm534_vm1, %v2302_v51, 0.0  ;;  %v2264_v37 = vadd.f32 %v2263_v30, %v2262_v63  ;;  %v3172_v8 = vadd.f32 %v3149_v62, %v3019_v4  ;;  %v2161_v15 = vpop.f32.mrb[3].mxu0 }
 0x168   : > { %v2317_v10 = vsel %vm534_vm1, %v2301_v12, 0.0  ;;  %v3173_v0 = vadd.f32 %v2161_v15, %v1220_v23 }
 0x169   : > { %v2319_v16 = vadd.f32 %v2318_v57, %v2317_v10  ;;  %2249 = vst.msk [vmem:[%s4151_s14 + $0x18] sm:$0xff] %vm534_vm1, %v3172_v8  ;;  %v2304_v26 = vmul.f32 %v3172_v8, %v3172_v8  ;;  %v2267_v18 = vsel %vm534_vm1, %v3172_v8, 0.0 }
 0x16a   : > { %2248 = vst.msk [vmem:[%s4151_s14 + $0x10] sm:$0xff] %vm534_vm1, %v3173_v0  ;;  %v2265_v52 = vsel %vm534_vm1, %v3173_v0, 0.0  ;;  %v2303_v20 = vmul.f32 %v3173_v0, %v3173_v0  ;;  %v3152_v44 = vpop.f32.mrb[4].mxu0 }
 0x16b   : > { %v2266_v28 = vadd.f32 %v2265_v52, %v2264_v37  ;;  %v3174_v32 = vadd.f32 %v3152_v44, %v3022_v36  ;;  %v2171_v11 = vpop.f32.mrb[5].mxu0  ;;  %v2322_v45 = vsel %vm534_vm1, %v2304_v26, 0.0 }
 0x16c   : > { %v2320_v19 = vsel %vm534_vm1, %v2303_v20, 0.0  ;;  %v3175_v33 = vadd.f32 %v2171_v11, %v1230_v25 }
 0x16d   : > { %v2321_v9 = vadd.f32 %v2320_v19, %v2319_v16  ;;  %2251 = vst.msk [vmem:[%s4151_s14 + $0x28] sm:$0xff] %vm534_vm1, %v3174_v32  ;;  %v2268_v42 = vadd.f32 %v2267_v18, %v2266_v28  ;;  %v2306_v14 = vmul.f32 %v3174_v32, %v3174_v32  ;;  %v2271_v31 = vsel %vm534_vm1, %v3174_v32, 0.0 }
 0x16e   : > { %2250 = vst.msk [vmem:[%s4151_s14 + $0x20] sm:$0xff] %vm534_vm1, %v3175_v33  ;;  %v2269_v56 = vsel %vm534_vm1, %v3175_v33, 0.0  ;;  %v2305_v21 = vmul.f32 %v3175_v33, %v3175_v33  ;;  %v3155_v59 = vpop.f32.mrb[6].mxu0 }
 0x16f   : > { %v2270_v24 = vadd.f32 %v2269_v56, %v2268_v42  ;;  %v2323_v7 = vadd.f32 %v2322_v45, %v2321_v9  ;;  %v3176_v13 = vadd.f32 %v3155_v59, %v3025_v46  ;;  %v3054_v39 = vpop.f32.mrb[8].mxu1  ;;  %v2181_v27 = vpop.f32.mrb[7].mxu0  ;;  %v2326_v55 = vsel %vm534_vm1, %v2306_v14, 0.0 }
 0x170   : > { %v2324_v17 = vsel %vm534_vm1, %v2305_v21, 0.0  ;;  %v3177_v2 = vadd.f32 %v2181_v27, %v1240_v48  ;;  %v1426_v38 = vpop.f32.mrb[9].mxu1 }
 0x171   : > { %v2325_v50 = vadd.f32 %v2324_v17, %v2323_v7  ;;  %2253 = vst.msk [vmem:[%s4151_s14 + $0x38] sm:$0xff] %vm534_vm1, %v3176_v13  ;;  %v2272_v54 = vadd.f32 %v2271_v31, %v2270_v24  ;;  %v2308_v58 = vmul.f32 %v3176_v13, %v3176_v13  ;;  %v2275_v43 = vsel %vm534_vm1, %v3176_v13, 0.0 }
 0x172   : > { %2252 = vst.msk [vmem:[%s4151_s14 + $0x30] sm:$0xff] %vm534_vm1, %v3177_v2  ;;  %v2273_v60 = vsel %vm534_vm1, %v3177_v2, 0.0  ;;  %v2307_v3 = vmul.f32 %v3177_v2, %v3177_v2  ;;  %v3158_v41 = vpop.f32.mrb[8].mxu0 }
 0x173   : > { %v2274_v1 = vadd.f32 %v2273_v60, %v2272_v54  ;;  %v2327_v29 = vadd.f32 %v2326_v55, %v2325_v50  ;;  %v3178_v34 = vadd.f32 %v3158_v41, %v3054_v39  ;;  %v3057_v35 = vpop.f32.mrb[10].mxu1  ;;  %v2191_v40 = vpop.f32.mrb[9].mxu0  ;;  %v2330_v36 = vsel %vm534_vm1, %v2308_v58, 0.0 }
 0x174   : > { %v2328_v47 = vsel %vm534_vm1, %v2307_v3, 0.0  ;;  %v3179_v49 = vadd.f32 %v2191_v40, %v1426_v38  ;;  %v1436_v53 = vpop.f32.mrb[11].mxu1 }
 0x175   : > { %v2329_v4 = vadd.f32 %v2328_v47, %v2327_v29  ;;  %2255 = vst.msk [vmem:[%s4151_s14 + $0x48] sm:$0xff] %vm534_vm1, %v3178_v34  ;;  %v2276_v23 = vadd.f32 %v2275_v43, %v2274_v1  ;;  %v2310_v25 = vmul.f32 %v3178_v34, %v3178_v34  ;;  %v2279_v63 = vsel %vm534_vm1, %v3178_v34, 0.0 }
 0x176   : > { %2254 = vst.msk [vmem:[%s4151_s14 + $0x40] sm:$0xff] %vm534_vm1, %v3179_v49  ;;  %v2277_v46 = vsel %vm534_vm1, %v3179_v49, 0.0  ;;  %v2309_v48 = vmul.f32 %v3179_v49, %v3179_v49  ;;  %v3161_v61 = vpop.f32.mrb[10].mxu0 }
 0x177   : > { %v2278_v5 = vadd.f32 %v2277_v46, %v2276_v23  ;;  %v2331_v6 = vadd.f32 %v2330_v36, %v2329_v4  ;;  %v3180_v22 = vadd.f32 %v3161_v61, %v3057_v35  ;;  %v3060_v30 = vpop.f32.mrb[12].mxu1  ;;  %v2201_v51 = vpop.f32.mrb[11].mxu0  ;;  %v2334_v15 = vsel %vm534_vm1, %v2310_v25, 0.0 }
 0x178   : > { %v2332_v12 = vsel %vm534_vm1, %v2309_v48, 0.0  ;;  %v3181_v62 = vadd.f32 %v2201_v51, %v1436_v53  ;;  %v1446_v57 = vpop.f32.mrb[13].mxu1 }
 0x179   : > { %v2333_v37 = vadd.f32 %v2332_v12, %v2331_v6  ;;  %2257 = vst.msk [vmem:[%s4151_s14 + $0x58] sm:$0xff] %vm534_vm1, %v3180_v22  ;;  %v2280_v8 = vadd.f32 %v2279_v63, %v2278_v5  ;;  %v2312_v10 = vmul.f32 %v3180_v22, %v3180_v22  ;;  %v2283_v11 = vsel %vm534_vm1, %v3180_v22, 0.0 }
 0x17a   : > { %2256 = vst.msk [vmem:[%s4151_s14 + $0x50] sm:$0xff] %vm534_vm1, %v3181_v62  ;;  %v2281_v0 = vsel %vm534_vm1, %v3181_v62, 0.0  ;;  %v2311_v16 = vmul.f32 %v3181_v62, %v3181_v62  ;;  %v3164_v26 = vpop.f32.mrb[12].mxu0 }
 0x17b   : > { %v2282_v52 = vadd.f32 %v2281_v0, %v2280_v8  ;;  %v2335_v20 = vadd.f32 %v2334_v15, %v2333_v37  ;;  %v3182_v44 = vadd.f32 %v3164_v26, %v3060_v30  ;;  %v3063_v28 = vpop.f32.mrb[14].mxu1  ;;  %v2211_v32 = vpop.f32.mrb[13].mxu0  ;;  %v2338_v45 = vsel %vm534_vm1, %v2312_v10, 0.0 }
 0x17c   : > { %v2336_v18 = vsel %vm534_vm1, %v2311_v16, 0.0  ;;  %v3183_v19 = vadd.f32 %v2211_v32, %v1446_v57  ;;  %v1456_v33 = vpop.f32.mrb[15].mxu1 }
 0x17d   : > { %v2337_v9 = vadd.f32 %v2336_v18, %v2335_v20  ;;  %2259 = vst.msk [vmem:[%s4151_s14 + $0x68] sm:$0xff] %vm534_vm1, %v3182_v44  ;;  %v2284_v42 = vadd.f32 %v2283_v11, %v2282_v52  ;;  %v2314_v14 = vmul.f32 %v3182_v44, %v3182_v44  ;;  %v2287_v27 = vsel %vm534_vm1, %v3182_v44, 0.0 }
 0x17e   : > { %2258 = vst.msk [vmem:[%s4151_s14 + $0x60] sm:$0xff] %vm534_vm1, %v3183_v19  ;;  %v2285_v56 = vsel %vm534_vm1, %v3183_v19, 0.0  ;;  %v2313_v21 = vmul.f32 %v3183_v19, %v3183_v19  ;;  %v3167_v59 = vpop.f32.mrb[14].mxu0 }
 0x17f   : > { %v2286_v24 = vadd.f32 %v2285_v56, %v2284_v42  ;;  %v2339_v7 = vadd.f32 %v2338_v45, %v2337_v9  ;;  %v3184_v13 = vadd.f32 %v3167_v59, %v3063_v28  ;;  %v2221_v39 = vpop.f32.mrb[15].mxu0  ;;  %v2342_v50 = vsel %vm534_vm1, %v2314_v14, 0.0 }
 0x180   : > { %v2340_v31 = vsel %vm534_vm1, %v2313_v21, 0.0  ;;  %v3185_v17 = vadd.f32 %v2221_v39, %v1456_v33 }
 0x181   : > { %v2341_v2 = vadd.f32 %v2340_v31, %v2339_v7  ;;  %2261 = vst.msk [vmem:[%s4151_s14 + $0x78] sm:$0xff] %vm534_vm1, %v3184_v13  ;;  %v2288_v38 = vadd.f32 %v2287_v27, %v2286_v24  ;;  %v2316_v54 = vmul.f32 %v3184_v13, %v3184_v13  ;;  %v2291_v41 = vsel %vm534_vm1, %v3184_v13, 0.0 }
 0x182   : > { %2260 = vst.msk [vmem:[%s4151_s14 + $0x70] sm:$0xff] %vm534_vm1, %v3185_v17  ;;  %v2289_v55 = vsel %vm534_vm1, %v3185_v17, 0.0  ;;  %v2315_v58 = vmul.f32 %v3185_v17, %v3185_v17 }
 0x183   : > { %v2290_v60 = vadd.f32 %v2289_v55, %v2288_v38  ;;  %v2343_v3 = vadd.f32 %v2342_v50, %v2341_v2  ;;  %v2346_v35 = vsel %vm534_vm1, %v2316_v54, 0.0 }
 0x184   : > { %v2344_v1 = vsel %vm534_vm1, %v2315_v58, 0.0 }
 0x185   : > { %v2292_v29 = vadd.f32 %v2291_v41, %v2290_v60  ;;  %v2345_v34 = vadd.f32 %v2344_v1, %v2343_v3 }
 0x187   : > { %v2293_v40 = vrot.slane %v2292_v29, 4  ;;  %v2347_v43 = vadd.f32 %v2346_v35, %v2345_v34 }
 0x189   : > { %v2294_v47 = vadd.f32 %v2293_v40, %v2292_v29  ;;  %v2348_v49 = vrot.slane %v2347_v43, 4 }
 0x18b   : > { %v2295_v53 = vrot.slane %v2294_v47, 2  ;;  %v2349_v4 = vadd.f32 %v2348_v49, %v2347_v43 }
 0x18d   : > { %v2296_v23 = vadd.f32 %v2295_v53, %v2294_v47  ;;  %v2350_v36 = vrot.slane %v2349_v4, 2 }
 0x18f   : > { %v2297_v25 = vrot.slane %v2296_v23, 1  ;;  %v2351_v46 = vadd.f32 %v2350_v36, %v2349_v4 }
 0x191   : > { %v2298_v48 = vadd.f32 %v2297_v25, %v2296_v23  ;;  %v2352_v61 = vrot.slane %v2351_v46, 1 }
 0x193   : > { %2300 = vst.msk [vmem:[%s449_s30] sm:$0x1] %vm2299_vm6, %v2298_v48  ;;  %v2353_v5 = vadd.f32 %v2352_v61, %v2351_v46 }
 0x195   : > { %2354 = vst.msk [vmem:[%s456_s15] sm:$0x1] %vm2299_vm6, %v2353_v5 }
 0x196 PF: > { %s17_s25 = sadd.s32 1, %s3380_s25   ;;  %s4264_s21 = smov %s3372_s23 }
 0x197   : > { %p14_p12 = scmp.ge.s32.totalorder %s17_s25, 6   ;;  %s4265_s22 = smov %s3376_s24 }
 0x198   : > { %s4266_s23 = smov %s4269_s26  ;;  %s4267_s24 = smov %s4273_s27 }
 0x199   :  { %16 = sbr.rel (!%p14_p12) target bundleno = 3 (0x3), region = 104 }

</bundles_post_ra>
